<compile_context>
chip_gen: v6e
topology: v6e:2x2x1
jax: 0.10.0
libtpu: 0.0.40
codegen_flags: <defaults>
</compile_context>

<pallas_src>
import functools

import numpy as np
import jax
import jax.numpy as jnp
from jax.experimental import pallas as pl
from jax.experimental.pallas import tpu as pltpu

IMG_SIZE = (16, 16)
SCALE_RANGE = (0.8, 1.2)

_GRAY_W = (0.2989, 0.587, 0.114)      # torchvision rgb_to_grayscale weights


def _round_up(x, m):
    return ((x + m - 1) // m) * m


def _rgb_to_gray(r, g, b):
    return _GRAY_W[0] * r + _GRAY_W[1] * g + _GRAY_W[2] * b


# --------------------------------------------------------------------------
# Fused kernel: color jitter -> (flip+resize+pad+crop as matmul pair) ->
#               lane-dense slab + per-mask validity.  One grid step per retry.
# --------------------------------------------------------------------------
def _make_fused_kernel(C, N, H, W, th, tw, slab_w, valid_w):

    def kernel(fac_ref,        # SMEM (R, 8) f32 jitter factors
               img_ref,        # (C, H, W)  f32            (same block every retry)
               masks_ref,      # (H, N*W)   f32 lane-packed (same block every retry)
               wh_i_ref,       # (1, th, H) f32 composed row transform, image
               wwt_i_ref,      # (1, W, tw) f32 composed col transform^T, image
               wh_m_ref,       # (1, th, H) f32 composed row transform, masks
               wwt_m_ref,      # (1, W, tw) f32 composed col transform^T, masks
               slab_ref,       # (1, th, slab_w) f32 lane-dense output slab
               valid_ref):     # (1, 8, valid_w) int32 per-mask validity
        ridx = pl.program_id(0)
        f_bright = fac_ref[ridx, 0]
        f_cpre = fac_ref[ridx, 1]
        f_sat = fac_ref[ridx, 2]
        f_hue = fac_ref[ridx, 3]
        hue_on = fac_ref[ridx, 4]     # 1.0 / 0.0
        f_cpost = fac_ref[ridx, 5]

        r = img_ref[0]
        g = img_ref[1]
        b = img_ref[2]

        # ---------------- color jitter (runtime factors; identity if skipped) --
        # brightness: _blend(img, 0, f).clamp(0,1); factor 1.0 == identity
        r = jnp.clip(r * f_bright, 0.0, 1.0)
        g = jnp.clip(g * f_bright, 0.0, 1.0)
        b = jnp.clip(b * f_bright, 0.0, 1.0)

        def _contrast(r, g, b, f):
            mean = jnp.mean(_rgb_to_gray(r, g, b))
            r = jnp.clip(f * r + (1.0 - f) * mean, 0.0, 1.0)
            g = jnp.clip(f * g + (1.0 - f) * mean, 0.0, 1.0)
            b = jnp.clip(f * b + (1.0 - f) * mean, 0.0, 1.0)
            return r, g, b

        # contrast-before-saturation/hue ordering goes through the "pre" slot,
        # the other ordering through the "post" slot (factor 1.0 == identity).
        r, g, b = _contrast(r, g, b, f_cpre)

        # saturation: _blend(img, gray, f)
        gray = _rgb_to_gray(r, g, b)
        r = jnp.clip(f_sat * r + (1.0 - f_sat) * gray, 0.0, 1.0)
        g = jnp.clip(f_sat * g + (1.0 - f_sat) * gray, 0.0, 1.0)
        b = jnp.clip(f_sat * b + (1.0 - f_sat) * gray, 0.0, 1.0)

        # hue: always computed, blended with a {0,1} gate (exact identity when off)
        maxc = jnp.maximum(jnp.maximum(r, g), b)
        minc = jnp.minimum(jnp.minimum(r, g), b)
        eqc = maxc == minc
        cr = maxc - minc
        ones = jnp.ones_like(maxc)
        sat = cr / jnp.where(eqc, ones, maxc)
        crd = jnp.where(eqc, ones, cr)
        rc = (maxc - r) / crd
        gc = (maxc - g) / crd
        bc = (maxc - b) / crd
        is_r = maxc == r
        is_g = (maxc == g) & (~is_r)
        is_b = (maxc != g) & (~is_r)
        h = (jnp.where(is_r, bc - gc, 0.0)
             + jnp.where(is_g, 2.0 + rc - bc, 0.0)
             + jnp.where(is_b, 4.0 + gc - rc, 0.0))
        h = jnp.mod(h / 6.0 + 1.0, 1.0)
        h = jnp.mod(h + f_hue, 1.0)
        v = maxc
        i6 = h * 6.0
        i = jnp.floor(i6)
        f = i6 - i
        i = jnp.where(i >= 6.0, i - 6.0, i)
        p = jnp.clip(v * (1.0 - sat), 0.0, 1.0)
        q = jnp.clip(v * (1.0 - sat * f), 0.0, 1.0)
        t = jnp.clip(v * (1.0 - sat * (1.0 - f)), 0.0, 1.0)

        def _sel(c0, c1, c2, c3, c4, c5):
            # comparisons recomputed per channel -> fewer live (H, W) temporaries
            return jnp.where(i < 1.0, c0,
                   jnp.where(i < 2.0, c1,
                   jnp.where(i < 3.0, c2,
                   jnp.where(i < 4.0, c3,
                   jnp.where(i < 5.0, c4, c5)))))

        one_m = 1.0 - hue_on
        r = hue_on * _sel(v, q, p, p, t, v) + one_m * r
        g = hue_on * _sel(t, v, v, q, p, p) + one_m * g
        b = hue_on * _sel(p, p, t, v, v, q) + one_m * b

        r, g, b = _contrast(r, g, b, f_cpost)

        # ---------------- geometry: flip+resize+pad+crop as one matmul pair ----
        wh_i = wh_i_ref[0]
        wwt_i = wwt_i_ref[0]
        img_packed = jnp.concatenate([r, g, b], axis=1)                  # (H, C*W)
        ti = jnp.dot(wh_i, img_packed,
                     preferred_element_type=jnp.float32)                 # (th, C*W)
        parts = []
        for c in range(C):
            parts.append(jnp.dot(ti[:, c * W:(c + 1) * W], wwt_i,
                                 preferred_element_type=jnp.float32))    # (th, tw)

        # masks: f32 end-to-end, values stay exactly {0, 1}
        wh_m = wh_m_ref[0]
        wwt_m = wwt_m_ref[0]
        tm = jnp.dot(wh_m, masks_ref[...],
                     preferred_element_type=jnp.float32)                 # (th, N*W)
        mask_parts = []
        for n in range(N):
            mask_parts.append(jnp.dot(tm[:, n * W:(n + 1) * W], wwt_m,
                                      preferred_element_type=jnp.float32))
        parts += mask_parts

        used = (C + N) * tw
        if slab_w > used:
            parts.append(jnp.zeros((th, slab_w - used), jnp.float32))
        slab_ref[0] = jnp.concatenate(parts, axis=1)                     # one unmasked store

        # ---------------- per-mask validity, full (8, valid_w) unmasked store ---
        col_ids = jax.lax.broadcasted_iota(jnp.int32, (8, valid_w), 1)
        acc = jnp.zeros((8, valid_w), jnp.float32)
        for n in range(N):
            acc = acc + (col_ids == n).astype(jnp.float32) * jnp.max(mask_parts[n])
        valid_ref[0] = (acc > 0.5).astype(jnp.int32)

    return kernel


@functools.lru_cache(maxsize=None)
def _build_fused_call(C, N, H, W, th, tw, R):
    if C != 3:
        raise NotImplementedError("color jitter assumes 3-channel images")
    slab_w = _round_up((C + N) * tw, 128)
    valid_w = _round_up(max(N, 1), 128)
    kernel = _make_fused_kernel(C, N, H, W, th, tw, slab_w, valid_w)
    fused = pl.pallas_call(
        kernel,
        out_shape=(
            jax.ShapeDtypeStruct((R, th, slab_w), jnp.float32),
            jax.ShapeDtypeStruct((R, 8, valid_w), jnp.int32),
        ),
        grid=(R,),
        in_specs=[
            pl.BlockSpec(memory_space=pltpu.MemorySpace.SMEM),     # (R, 8) factors
            pl.BlockSpec((C, H, W), lambda r: (0, 0, 0)),          # image
            pl.BlockSpec((H, N * W), lambda r: (0, 0)),            # packed masks
            pl.BlockSpec((1, th, H), lambda r: (r, 0, 0)),         # Wh image
            pl.BlockSpec((1, W, tw), lambda r: (r, 0, 0)),         # Ww^T image
            pl.BlockSpec((1, th, H), lambda r: (r, 0, 0)),         # Wh masks
            pl.BlockSpec((1, W, tw), lambda r: (r, 0, 0)),         # Ww^T masks
        ],
        out_specs=(
            pl.BlockSpec((1, th, slab_w), lambda r: (r, 0, 0)),
            pl.BlockSpec((1, 8, valid_w), lambda r: (r, 0, 0)),
        ),
        compiler_params=pltpu.CompilerParams(
            dimension_semantics=("parallel",)),   # retries shard across v7x's 2 TCs
    )
    return jax.jit(fused), slab_w, valid_w


# --------------------------------------------------------------------------
# Host-side (numpy) weight construction: flip/resize/pad/crop composed
# --------------------------------------------------------------------------
def _bilinear_matrix(out_size, in_size):
    o = np.arange(out_size)
    src = (o + 0.5) * (in_size / out_size) - 0.5
    i0 = np.floor(src).astype(np.int64)
    frac = (src - i0).astype(np.float32)
    lo = np.clip(i0, 0, in_size - 1)
    hi = np.clip(i0 + 1, 0, in_size - 1)
    w = np.zeros((out_size, in_size), np.float32)
    w[o, lo] += (1.0 - frac)
    w[o, hi] += frac
    return w


def _nearest_matrix(out_size, in_size):
    o = np.arange(out_size)
    idx = np.clip(np.floor(o * (in_size / out_size)).astype(np.int64), 0, in_size - 1)
    w = np.zeros((out_size, in_size), np.float32)
    w[o, idx] = 1.0
    return w


def _flip_matrix(n):
    return np.eye(n, dtype=np.float32)[::-1].copy()


def _crop_pad_matrix(out_size, in_size, offset):
    """Rows [offset, offset+out_size) of the input, zero-padded past the end."""
    w = np.zeros((out_size, in_size), np.float32)
    o = np.arange(out_size)
    src = o + offset
    ok = src < in_size
    w[o[ok], src[ok]] = 1.0
    return w


# --------------------------------------------------------------------------
# Host-side module (randomness via numpy; one launch, one D2H sync per forward)
# --------------------------------------------------------------------------
class TransformsPallas:
    def __init__(self, img_size, color_jitter_enabled, scale_range,
                 max_brightness_delta=32, max_contrast_factor=0.5,
                 saturation_factor=0.5, max_hue_delta=18):
        self.img_size = tuple(img_size)
        self.color_jitter_enabled = color_jitter_enabled
        self.scale_range = scale_range
        self.max_brightness_factor = max_brightness_delta / 255.0
        self.max_contrast_factor = max_contrast_factor
        self.max_saturation_factor = saturation_factor
        self.max_hue_delta = max_hue_delta / 360.0

    @staticmethod
    def _filter(target, keep):
        keep = np.asarray(keep, dtype=bool)
        idx = np.nonzero(keep)[0]
        out = {}
        for k, v in target.items():
            if isinstance(v, (jax.Array, np.ndarray)):
                out[k] = jnp.asarray(v)[idx]
            else:
                out[k] = v
        return out

    def _color_jitter_factors(self, rng):
        # fac = [brightness, contrast_pre, saturation, hue, hue_on, contrast_post, 0, 0]
        fac = np.array([1.0, 1.0, 1.0, 0.0, 0.0, 1.0, 0.0, 0.0], np.float32)
        if not self.color_jitter_enabled:
            return fac
        if rng.random() < 0.5:
            fac[0] = rng.uniform(1.0 - self.max_brightness_factor,
                                 1.0 + self.max_brightness_factor)
        contrast = 1.0
        if rng.random() < 0.5:
            contrast = rng.uniform(1.0 - self.max_contrast_factor,
                                   1.0 + self.max_contrast_factor)
        if rng.random() < 0.5:
            fac[2] = rng.uniform(1.0 - self.max_saturation_factor,
                                 1.0 + self.max_saturation_factor)
        if rng.random() < 0.5:
            fac[3] = rng.uniform(-self.max_hue_delta, self.max_hue_delta)
            fac[4] = 1.0
        if rng.random() < 0.5:          # contrast applied before saturation/hue
            fac[1] = contrast
        else:                           # contrast applied after saturation/hue
            fac[5] = contrast
        return fac

    def forward(self, img, target, seed=0, max_retries=8):
        rng = np.random.default_rng(seed)
        img = jnp.asarray(img, jnp.float32)
        C, H, W = img.shape
        th, tw = self.img_size
        R = int(max_retries)

        target_f = self._filter(target, ~np.asarray(target["is_crowd"], dtype=bool))
        masks_f = jnp.asarray(target_f["masks"], jnp.float32)
        N = int(masks_f.shape[0])
        # TODO(synk): N == 0 (everything is_crowd) is not handled; the original
        #             module would recurse forever in that case anyway.
        masks_packed = jnp.transpose(masks_f, (1, 0, 2)).reshape(H, N * W)

        # ---- all per-retry randomness + composed geometry on the host, stacked ----
        fac_all = np.zeros((R, 8), np.float32)
        wh_i_all = np.zeros((R, th, H), np.float32)
        wwt_i_all = np.zeros((R, W, tw), np.float32)
        wh_m_all = np.zeros((R, th, H), np.float32)
        wwt_m_all = np.zeros((R, W, tw), np.float32)
        for r in range(R):
            fac_all[r] = self._color_jitter_factors(rng)
            do_flip = rng.random() < 0.5
            scale = float(rng.uniform(self.scale_range[0], self.scale_range[1]))
            # torchvision ScaleJitter convention
            ratio = min(self.img_size[1] / H, self.img_size[0] / W) * scale
            new_h = max(1, int(H * ratio))
            new_w = max(1, int(W * ratio))
            ph, pw = max(new_h, th), max(new_w, tw)
            top = int(rng.integers(0, ph - th + 1))
            left = int(rng.integers(0, pw - tw + 1))

            crop_r = _crop_pad_matrix(th, new_h, top)
            crop_c = _crop_pad_matrix(tw, new_w, left)
            flip = _flip_matrix(W) if do_flip else np.eye(W, dtype=np.float32)
            wh_i_all[r] = crop_r @ _bilinear_matrix(new_h, H)
            wwt_i_all[r] = (crop_c @ _bilinear_matrix(new_w, W) @ flip).T
            wh_m_all[r] = crop_r @ _nearest_matrix(new_h, H)
            wwt_m_all[r] = (crop_c @ _nearest_matrix(new_w, W) @ flip).T

        fused, slab_w, valid_w = _build_fused_call(C, N, H, W, th, tw, R)
        slab, valid_dev = fused(
            jnp.asarray(fac_all), img, masks_packed,
            jnp.asarray(wh_i_all), jnp.asarray(wwt_i_all),
            jnp.asarray(wh_m_all), jnp.asarray(wwt_m_all))

        # The ONLY device->host sync of the whole forward(): (R, N) validity.
        valid_host = np.asarray(valid_dev)[:, 0, :N].astype(bool)

        r_sel = -1
        for r in range(R):
            if valid_host[r].any():
                r_sel = r
                break
        if r_sel < 0:
            # TODO(synk): original recurses unboundedly when every attempt yields
            #             empty masks; here the last attempt is returned unfiltered.
            r_sel = R - 1
            keep = np.ones((N,), bool)
        else:
            keep = valid_host[r_sel]

        slab_r = slab[r_sel]                                       # stays on device
        out_img = jnp.transpose(slab_r[:, :C * tw].reshape(th, C, tw), (1, 0, 2))
        out_masks = jnp.transpose(
            slab_r[:, C * tw:(C + N) * tw].reshape(th, N, tw), (1, 0, 2)) > 0.5

        new_target = dict(target_f)
        new_target["masks"] = out_masks
        return out_img, self._filter(new_target, keep)


# --------------------------------------------------------------------------
if __name__ == "__main__":
    key = jax.random.PRNGKey(0)

    H, W, N = 20, 24, 4
    img = jax.random.uniform(key, (3, H, W), dtype=jnp.float32)

    masks_np = np.zeros((N, H, W), np.float32)
    masks_np[0, 2:18, 2:20] = 1.0
    masks_np[1, 5:15, 4:22] = 1.0
    masks_np[2, 0:10, 0:12] = 1.0
    masks_np[3, 8:20, 10:24] = 1.0

    target = {
        "masks": jnp.asarray(masks_np),
        "labels": jnp.arange(N, dtype=jnp.int32),
        "is_crowd": jnp.asarray(np.array([False, False, True, False])),
        "image_id": 7,  # non-tensor field, passed through by _filter
    }

    tfm = TransformsPallas(IMG_SIZE, color_jitter_enabled=True, scale_range=SCALE_RANGE)
    out_img, out_target = tfm.forward(img, target, seed=0)

    jax.block_until_ready(out_img)
    jax.block_until_ready(out_target["masks"])
    assert out_img.shape == (3, IMG_SIZE[0], IMG_SIZE[1])
    assert out_target["masks"].shape[-2:] == IMG_SIZE
    print("KERNEL_OK")
</pallas_src>

<mosaic_0001>
module attributes {stable_mosaic.version = 11 : i64} {
  func.func @kernel(%arg0: i32, %arg1: memref<8x8xf32, #tpu.memory_space<smem>>, %arg2: memref<3x20x24xf32, #tpu.memory_space<vmem>>, %arg3: memref<20x72xf32, #tpu.memory_space<vmem>>, %arg4: memref<1x16x20xf32, #tpu.memory_space<vmem>>, %arg5: memref<1x24x16xf32, #tpu.memory_space<vmem>>, %arg6: memref<1x16x20xf32, #tpu.memory_space<vmem>>, %arg7: memref<1x24x16xf32, #tpu.memory_space<vmem>>, %arg8: memref<1x16x128xf32, #tpu.memory_space<vmem>>, %arg9: memref<1x8x128xi32, #tpu.memory_space<vmem>>) attributes {dimension_semantics = [#tpu.dimension_semantics<parallel>], iteration_bounds = array<i64: 8>, scalar_prefetch = 0 : i64, scratch_operands = 0 : i64, tpu.core_type = #tpu.core_type<tc>, window_params = [{transform_indices = @transform_0, window_bounds = array<i64: 8, 8>}, {pipeline_mode = #tpu.pipeline_mode<synchronous>, transform_indices = @transform_1, window_bounds = array<i64: 3, 20, 24>}, {pipeline_mode = #tpu.pipeline_mode<synchronous>, transform_indices = @transform_2, window_bounds = array<i64: 20, 72>}, {transform_indices = @transform_3, window_bounds = array<i64: 1, 16, 20>}, {transform_indices = @transform_4, window_bounds = array<i64: 1, 24, 16>}, {transform_indices = @transform_5, window_bounds = array<i64: 1, 16, 20>}, {transform_indices = @transform_6, window_bounds = array<i64: 1, 24, 16>}, {transform_indices = @transform_7, window_bounds = array<i64: 1, 16, 128>}, {transform_indices = @transform_8, window_bounds = array<i64: 1, 8, 128>}]} {
    %0 = arith.index_cast %arg0 : i32 to index
    %c0 = arith.constant 0 : index
    %1 = memref.load %arg1[%0, %c0] : memref<8x8xf32, #tpu.memory_space<smem>>
    %2 = arith.index_cast %arg0 : i32 to index
    %c1 = arith.constant 1 : index
    %3 = memref.load %arg1[%2, %c1] : memref<8x8xf32, #tpu.memory_space<smem>>
    %4 = arith.index_cast %arg0 : i32 to index
    %c2 = arith.constant 2 : index
    %5 = memref.load %arg1[%4, %c2] : memref<8x8xf32, #tpu.memory_space<smem>>
    %6 = arith.index_cast %arg0 : i32 to index
    %c3 = arith.constant 3 : index
    %7 = memref.load %arg1[%6, %c3] : memref<8x8xf32, #tpu.memory_space<smem>>
    %8 = arith.index_cast %arg0 : i32 to index
    %c4 = arith.constant 4 : index
    %9 = memref.load %arg1[%8, %c4] : memref<8x8xf32, #tpu.memory_space<smem>>
    %10 = arith.index_cast %arg0 : i32 to index
    %c5 = arith.constant 5 : index
    %11 = memref.load %arg1[%10, %c5] : memref<8x8xf32, #tpu.memory_space<smem>>
    %c0_0 = arith.constant 0 : index
    %c0_1 = arith.constant 0 : index
    %c0_2 = arith.constant 0 : index
    %12 = vector.load %arg2[%c0_0, %c0_1, %c0_2] : memref<3x20x24xf32, #tpu.memory_space<vmem>>, vector<1x20x24xf32>
    %13 = vector.shape_cast %12 : vector<1x20x24xf32> to vector<20x24xf32>
    %c1_3 = arith.constant 1 : index
    %c0_4 = arith.constant 0 : index
    %c0_5 = arith.constant 0 : index
    %14 = vector.load %arg2[%c1_3, %c0_4, %c0_5] : memref<3x20x24xf32, #tpu.memory_space<vmem>>, vector<1x20x24xf32>
    %15 = vector.shape_cast %14 : vector<1x20x24xf32> to vector<20x24xf32>
    %c2_6 = arith.constant 2 : index
    %c0_7 = arith.constant 0 : index
    %c0_8 = arith.constant 0 : index
    %16 = vector.load %arg2[%c2_6, %c0_7, %c0_8] : memref<3x20x24xf32, #tpu.memory_space<vmem>>, vector<1x20x24xf32>
    %17 = vector.shape_cast %16 : vector<1x20x24xf32> to vector<20x24xf32>
    %18 = vector.broadcast %1 : f32 to vector<20x24xf32>
    %19 = arith.mulf %13, %18 : vector<20x24xf32>
    %cst = arith.constant 0.000000e+00 : f32
    %cst_9 = arith.constant 1.000000e+00 : f32
    %20 = vector.broadcast %cst : f32 to vector<20x24xf32>
    %21 = arith.maximumf %20, %19 : vector<20x24xf32>
    %22 = vector.broadcast %cst_9 : f32 to vector<20x24xf32>
    %23 = arith.minimumf %22, %21 : vector<20x24xf32>
    %24 = vector.broadcast %1 : f32 to vector<20x24xf32>
    %25 = arith.mulf %15, %24 : vector<20x24xf32>
    %cst_10 = arith.constant 0.000000e+00 : f32
    %cst_11 = arith.constant 1.000000e+00 : f32
    %26 = vector.broadcast %cst_10 : f32 to vector<20x24xf32>
    %27 = arith.maximumf %26, %25 : vector<20x24xf32>
    %28 = vector.broadcast %cst_11 : f32 to vector<20x24xf32>
    %29 = arith.minimumf %28, %27 : vector<20x24xf32>
    %30 = vector.broadcast %1 : f32 to vector<20x24xf32>
    %31 = arith.mulf %17, %30 : vector<20x24xf32>
    %cst_12 = arith.constant 0.000000e+00 : f32
    %cst_13 = arith.constant 1.000000e+00 : f32
    %32 = vector.broadcast %cst_12 : f32 to vector<20x24xf32>
    %33 = arith.maximumf %32, %31 : vector<20x24xf32>
    %34 = vector.broadcast %cst_13 : f32 to vector<20x24xf32>
    %35 = arith.minimumf %34, %33 : vector<20x24xf32>
    %cst_14 = arith.constant 2.989000e-01 : f32
    %36 = vector.broadcast %cst_14 : f32 to vector<20x24xf32>
    %37 = arith.mulf %36, %23 : vector<20x24xf32>
    %cst_15 = arith.constant 5.870000e-01 : f32
    %38 = vector.broadcast %cst_15 : f32 to vector<20x24xf32>
    %39 = arith.mulf %38, %29 : vector<20x24xf32>
    %40 = arith.addf %37, %39 : vector<20x24xf32>
    %cst_16 = arith.constant 1.140000e-01 : f32
    %41 = vector.broadcast %cst_16 : f32 to vector<20x24xf32>
    %42 = arith.mulf %41, %35 : vector<20x24xf32>
    %43 = arith.addf %40, %42 : vector<20x24xf32>
    %44 = vector.shape_cast %43 : vector<20x24xf32> to vector<1x20x24xf32>
    %cst_17 = arith.constant dense<0.000000e+00> : vector<1xf32>
    %45 = vector.multi_reduction <add>, %44, %cst_17 [1, 2] : vector<1x20x24xf32> to vector<1xf32>
    %46 = vector.shape_cast %45 : vector<1xf32> to vector<1x1x1xf32>
    %47 = vector.extract %46[0, 0, 0] : f32 from vector<1x1x1xf32>
    %cst_18 = arith.constant 4.800000e+02 : f32
    %48 = arith.divf %47, %cst_18 : f32
    %49 = vector.broadcast %3 : f32 to vector<20x24xf32>
    %50 = arith.mulf %49, %23 : vector<20x24xf32>
    %cst_19 = arith.constant 1.000000e+00 : f32
    %51 = arith.subf %cst_19, %3 : f32
    %52 = arith.mulf %51, %48 : f32
    %53 = vector.broadcast %52 : f32 to vector<20x24xf32>
    %54 = arith.addf %50, %53 : vector<20x24xf32>
    %cst_20 = arith.constant 0.000000e+00 : f32
    %cst_21 = arith.constant 1.000000e+00 : f32
    %55 = vector.broadcast %cst_20 : f32 to vector<20x24xf32>
    %56 = arith.maximumf %55, %54 : vector<20x24xf32>
    %57 = vector.broadcast %cst_21 : f32 to vector<20x24xf32>
    %58 = arith.minimumf %57, %56 : vector<20x24xf32>
    %59 = vector.broadcast %3 : f32 to vector<20x24xf32>
    %60 = arith.mulf %59, %29 : vector<20x24xf32>
    %cst_22 = arith.constant 1.000000e+00 : f32
    %61 = arith.subf %cst_22, %3 : f32
    %62 = arith.mulf %61, %48 : f32
    %63 = vector.broadcast %62 : f32 to vector<20x24xf32>
    %64 = arith.addf %60, %63 : vector<20x24xf32>
    %cst_23 = arith.constant 0.000000e+00 : f32
    %cst_24 = arith.constant 1.000000e+00 : f32
    %65 = vector.broadcast %cst_23 : f32 to vector<20x24xf32>
    %66 = arith.maximumf %65, %64 : vector<20x24xf32>
    %67 = vector.broadcast %cst_24 : f32 to vector<20x24xf32>
    %68 = arith.minimumf %67, %66 : vector<20x24xf32>
    %69 = vector.broadcast %3 : f32 to vector<20x24xf32>
    %70 = arith.mulf %69, %35 : vector<20x24xf32>
    %cst_25 = arith.constant 1.000000e+00 : f32
    %71 = arith.subf %cst_25, %3 : f32
    %72 = arith.mulf %71, %48 : f32
    %73 = vector.broadcast %72 : f32 to vector<20x24xf32>
    %74 = arith.addf %70, %73 : vector<20x24xf32>
    %cst_26 = arith.constant 0.000000e+00 : f32
    %cst_27 = arith.constant 1.000000e+00 : f32
    %75 = vector.broadcast %cst_26 : f32 to vector<20x24xf32>
    %76 = arith.maximumf %75, %74 : vector<20x24xf32>
    %77 = vector.broadcast %cst_27 : f32 to vector<20x24xf32>
    %78 = arith.minimumf %77, %76 : vector<20x24xf32>
    %cst_28 = arith.constant 2.989000e-01 : f32
    %79 = vector.broadcast %cst_28 : f32 to vector<20x24xf32>
    %80 = arith.mulf %79, %58 : vector<20x24xf32>
    %cst_29 = arith.constant 5.870000e-01 : f32
    %81 = vector.broadcast %cst_29 : f32 to vector<20x24xf32>
    %82 = arith.mulf %81, %68 : vector<20x24xf32>
    %83 = arith.addf %80, %82 : vector<20x24xf32>
    %cst_30 = arith.constant 1.140000e-01 : f32
    %84 = vector.broadcast %cst_30 : f32 to vector<20x24xf32>
    %85 = arith.mulf %84, %78 : vector<20x24xf32>
    %86 = arith.addf %83, %85 : vector<20x24xf32>
    %87 = vector.broadcast %5 : f32 to vector<20x24xf32>
    %88 = arith.mulf %87, %58 : vector<20x24xf32>
    %cst_31 = arith.constant 1.000000e+00 : f32
    %89 = arith.subf %cst_31, %5 : f32
    %90 = vector.broadcast %89 : f32 to vector<20x24xf32>
    %91 = arith.mulf %90, %86 : vector<20x24xf32>
    %92 = arith.addf %88, %91 : vector<20x24xf32>
    %cst_32 = arith.constant 0.000000e+00 : f32
    %cst_33 = arith.constant 1.000000e+00 : f32
    %93 = vector.broadcast %cst_32 : f32 to vector<20x24xf32>
    %94 = arith.maximumf %93, %92 : vector<20x24xf32>
    %95 = vector.broadcast %cst_33 : f32 to vector<20x24xf32>
    %96 = arith.minimumf %95, %94 : vector<20x24xf32>
    %97 = vector.broadcast %5 : f32 to vector<20x24xf32>
    %98 = arith.mulf %97, %68 : vector<20x24xf32>
    %cst_34 = arith.constant 1.000000e+00 : f32
    %99 = arith.subf %cst_34, %5 : f32
    %100 = vector.broadcast %99 : f32 to vector<20x24xf32>
    %101 = arith.mulf %100, %86 : vector<20x24xf32>
    %102 = arith.addf %98, %101 : vector<20x24xf32>
    %cst_35 = arith.constant 0.000000e+00 : f32
    %cst_36 = arith.constant 1.000000e+00 : f32
    %103 = vector.broadcast %cst_35 : f32 to vector<20x24xf32>
    %104 = arith.maximumf %103, %102 : vector<20x24xf32>
    %105 = vector.broadcast %cst_36 : f32 to vector<20x24xf32>
    %106 = arith.minimumf %105, %104 : vector<20x24xf32>
    %107 = vector.broadcast %5 : f32 to vector<20x24xf32>
    %108 = arith.mulf %107, %78 : vector<20x24xf32>
    %cst_37 = arith.constant 1.000000e+00 : f32
    %109 = arith.subf %cst_37, %5 : f32
    %110 = vector.broadcast %109 : f32 to vector<20x24xf32>
    %111 = arith.mulf %110, %86 : vector<20x24xf32>
    %112 = arith.addf %108, %111 : vector<20x24xf32>
    %cst_38 = arith.constant 0.000000e+00 : f32
    %cst_39 = arith.constant 1.000000e+00 : f32
    %113 = vector.broadcast %cst_38 : f32 to vector<20x24xf32>
    %114 = arith.maximumf %113, %112 : vector<20x24xf32>
    %115 = vector.broadcast %cst_39 : f32 to vector<20x24xf32>
    %116 = arith.minimumf %115, %114 : vector<20x24xf32>
    %117 = arith.maximumf %96, %106 : vector<20x24xf32>
    %118 = arith.maximumf %117, %116 : vector<20x24xf32>
    %119 = arith.minimumf %96, %106 : vector<20x24xf32>
    %120 = arith.minimumf %119, %116 : vector<20x24xf32>
    %121 = arith.cmpf oeq, %118, %120 : vector<20x24xf32>
    %122 = arith.subf %118, %120 : vector<20x24xf32>
    %cst_40 = arith.constant 1.000000e+00 : f32
    %123 = vector.broadcast %cst_40 : f32 to vector<20x24xf32>
    %124 = arith.select %121, %123, %118 : vector<20x24xi1>, vector<20x24xf32>
    %125 = arith.divf %122, %124 : vector<20x24xf32>
    %126 = arith.select %121, %123, %122 : vector<20x24xi1>, vector<20x24xf32>
    %127 = arith.subf %118, %96 : vector<20x24xf32>
    %128 = arith.divf %127, %126 : vector<20x24xf32>
    %129 = arith.subf %118, %106 : vector<20x24xf32>
    %130 = arith.divf %129, %126 : vector<20x24xf32>
    %131 = arith.subf %118, %116 : vector<20x24xf32>
    %132 = arith.divf %131, %126 : vector<20x24xf32>
    %133 = arith.cmpf oeq, %118, %96 : vector<20x24xf32>
    %134 = arith.cmpf oeq, %118, %106 : vector<20x24xf32>
    %cst_41 = arith.constant dense<true> : vector<20x24xi1>
    %135 = arith.xori %133, %cst_41 : vector<20x24xi1>
    %136 = arith.andi %134, %135 : vector<20x24xi1>
    %137 = arith.cmpf one, %118, %106 : vector<20x24xf32>
    %cst_42 = arith.constant dense<true> : vector<20x24xi1>
    %138 = arith.xori %133, %cst_42 : vector<20x24xi1>
    %139 = arith.andi %137, %138 : vector<20x24xi1>
    %140 = arith.subf %132, %130 : vector<20x24xf32>
    %cst_43 = arith.constant 0.000000e+00 : f32
    %141 = vector.broadcast %cst_43 : f32 to vector<20x24xf32>
    %142 = arith.select %133, %140, %141 : vector<20x24xi1>, vector<20x24xf32>
    %cst_44 = arith.constant 2.000000e+00 : f32
    %143 = vector.broadcast %cst_44 : f32 to vector<20x24xf32>
    %144 = arith.addf %143, %128 : vector<20x24xf32>
    %145 = arith.subf %144, %132 : vector<20x24xf32>
    %cst_45 = arith.constant 0.000000e+00 : f32
    %146 = vector.broadcast %cst_45 : f32 to vector<20x24xf32>
    %147 = arith.select %136, %145, %146 : vector<20x24xi1>, vector<20x24xf32>
    %148 = arith.addf %142, %147 : vector<20x24xf32>
    %cst_46 = arith.constant 4.000000e+00 : f32
    %149 = vector.broadcast %cst_46 : f32 to vector<20x24xf32>
    %150 = arith.addf %149, %130 : vector<20x24xf32>
    %151 = arith.subf %150, %128 : vector<20x24xf32>
    %cst_47 = arith.constant 0.000000e+00 : f32
    %152 = vector.broadcast %cst_47 : f32 to vector<20x24xf32>
    %153 = arith.select %139, %151, %152 : vector<20x24xi1>, vector<20x24xf32>
    %154 = arith.addf %148, %153 : vector<20x24xf32>
    %cst_48 = arith.constant 6.000000e+00 : f32
    %155 = vector.broadcast %cst_48 : f32 to vector<20x24xf32>
    %156 = arith.divf %154, %155 : vector<20x24xf32>
    %cst_49 = arith.constant 1.000000e+00 : f32
    %157 = vector.broadcast %cst_49 : f32 to vector<20x24xf32>
    %158 = arith.addf %156, %157 : vector<20x24xf32>
    %cst_50 = arith.constant 1.000000e+00 : f32
    %159 = vector.broadcast %cst_50 : f32 to vector<20x24xf32>
    %160 = arith.remf %158, %159 : vector<20x24xf32>
    %cst_51 = arith.constant 0.000000e+00 : f32
    %161 = vector.broadcast %cst_51 : f32 to vector<20x24xf32>
    %162 = arith.cmpf one, %160, %161 : vector<20x24xf32>
    %cst_52 = arith.constant 0.000000e+00 : f32
    %163 = vector.broadcast %cst_52 : f32 to vector<20x24xf32>
    %164 = arith.cmpf olt, %160, %163 : vector<20x24xf32>
    %cst_53 = arith.constant 0.000000e+00 : f32
    %165 = arith.cmpf olt, %cst_50, %cst_53 : f32
    %166 = vector.broadcast %165 : i1 to vector<20x24xi1>
    %167 = vector.broadcast %166 : vector<20x24xi1> to vector<20x24xi1>
    %168 = arith.xori %164, %167 : vector<20x24xi1>
    %169 = arith.andi %168, %162 : vector<20x24xi1>
    %170 = vector.broadcast %cst_50 : f32 to vector<20x24xf32>
    %171 = arith.addf %160, %170 : vector<20x24xf32>
    %172 = arith.select %169, %171, %160 : vector<20x24xi1>, vector<20x24xf32>
    %173 = vector.broadcast %7 : f32 to vector<20x24xf32>
    %174 = arith.addf %172, %173 : vector<20x24xf32>
    %cst_54 = arith.constant 1.000000e+00 : f32
    %175 = vector.broadcast %cst_54 : f32 to vector<20x24xf32>
    %176 = arith.remf %174, %175 : vector<20x24xf32>
    %cst_55 = arith.constant 0.000000e+00 : f32
    %177 = vector.broadcast %cst_55 : f32 to vector<20x24xf32>
    %178 = arith.cmpf one, %176, %177 : vector<20x24xf32>
    %cst_56 = arith.constant 0.000000e+00 : f32
    %179 = vector.broadcast %cst_56 : f32 to vector<20x24xf32>
    %180 = arith.cmpf olt, %176, %179 : vector<20x24xf32>
    %cst_57 = arith.constant 0.000000e+00 : f32
    %181 = arith.cmpf olt, %cst_54, %cst_57 : f32
    %182 = vector.broadcast %181 : i1 to vector<20x24xi1>
    %183 = vector.broadcast %182 : vector<20x24xi1> to vector<20x24xi1>
    %184 = arith.xori %180, %183 : vector<20x24xi1>
    %185 = arith.andi %184, %178 : vector<20x24xi1>
    %186 = vector.broadcast %cst_54 : f32 to vector<20x24xf32>
    %187 = arith.addf %176, %186 : vector<20x24xf32>
    %188 = arith.select %185, %187, %176 : vector<20x24xi1>, vector<20x24xf32>
    %cst_58 = arith.constant 6.000000e+00 : f32
    %189 = vector.broadcast %cst_58 : f32 to vector<20x24xf32>
    %190 = arith.mulf %188, %189 : vector<20x24xf32>
    %191 = math.floor %190 : vector<20x24xf32>
    %192 = arith.subf %190, %191 : vector<20x24xf32>
    %cst_59 = arith.constant 6.000000e+00 : f32
    %193 = vector.broadcast %cst_59 : f32 to vector<20x24xf32>
    %194 = arith.cmpf oge, %191, %193 : vector<20x24xf32>
    %cst_60 = arith.constant 6.000000e+00 : f32
    %195 = vector.broadcast %cst_60 : f32 to vector<20x24xf32>
    %196 = arith.subf %191, %195 : vector<20x24xf32>
    %197 = arith.select %194, %196, %191 : vector<20x24xi1>, vector<20x24xf32>
    %cst_61 = arith.constant 1.000000e+00 : f32
    %198 = vector.broadcast %cst_61 : f32 to vector<20x24xf32>
    %199 = arith.subf %198, %125 : vector<20x24xf32>
    %200 = arith.mulf %118, %199 : vector<20x24xf32>
    %cst_62 = arith.constant 0.000000e+00 : f32
    %cst_63 = arith.constant 1.000000e+00 : f32
    %201 = vector.broadcast %cst_62 : f32 to vector<20x24xf32>
    %202 = arith.maximumf %201, %200 : vector<20x24xf32>
    %203 = vector.broadcast %cst_63 : f32 to vector<20x24xf32>
    %204 = arith.minimumf %203, %202 : vector<20x24xf32>
    %205 = arith.mulf %125, %192 : vector<20x24xf32>
    %cst_64 = arith.constant 1.000000e+00 : f32
    %206 = vector.broadcast %cst_64 : f32 to vector<20x24xf32>
    %207 = arith.subf %206, %205 : vector<20x24xf32>
    %208 = arith.mulf %118, %207 : vector<20x24xf32>
    %cst_65 = arith.constant 0.000000e+00 : f32
    %cst_66 = arith.constant 1.000000e+00 : f32
    %209 = vector.broadcast %cst_65 : f32 to vector<20x24xf32>
    %210 = arith.maximumf %209, %208 : vector<20x24xf32>
    %211 = vector.broadcast %cst_66 : f32 to vector<20x24xf32>
    %212 = arith.minimumf %211, %210 : vector<20x24xf32>
    %cst_67 = arith.constant 1.000000e+00 : f32
    %213 = vector.broadcast %cst_67 : f32 to vector<20x24xf32>
    %214 = arith.subf %213, %192 : vector<20x24xf32>
    %215 = arith.mulf %125, %214 : vector<20x24xf32>
    %cst_68 = arith.constant 1.000000e+00 : f32
    %216 = vector.broadcast %cst_68 : f32 to vector<20x24xf32>
    %217 = arith.subf %216, %215 : vector<20x24xf32>
    %218 = arith.mulf %118, %217 : vector<20x24xf32>
    %cst_69 = arith.constant 0.000000e+00 : f32
    %cst_70 = arith.constant 1.000000e+00 : f32
    %219 = vector.broadcast %cst_69 : f32 to vector<20x24xf32>
    %220 = arith.maximumf %219, %218 : vector<20x24xf32>
    %221 = vector.broadcast %cst_70 : f32 to vector<20x24xf32>
    %222 = arith.minimumf %221, %220 : vector<20x24xf32>
    %cst_71 = arith.constant 1.000000e+00 : f32
    %223 = arith.subf %cst_71, %9 : f32
    %cst_72 = arith.constant 1.000000e+00 : f32
    %224 = vector.broadcast %cst_72 : f32 to vector<20x24xf32>
    %225 = arith.cmpf olt, %197, %224 : vector<20x24xf32>
    %cst_73 = arith.constant 2.000000e+00 : f32
    %226 = vector.broadcast %cst_73 : f32 to vector<20x24xf32>
    %227 = arith.cmpf olt, %197, %226 : vector<20x24xf32>
    %cst_74 = arith.constant 3.000000e+00 : f32
    %228 = vector.broadcast %cst_74 : f32 to vector<20x24xf32>
    %229 = arith.cmpf olt, %197, %228 : vector<20x24xf32>
    %cst_75 = arith.constant 4.000000e+00 : f32
    %230 = vector.broadcast %cst_75 : f32 to vector<20x24xf32>
    %231 = arith.cmpf olt, %197, %230 : vector<20x24xf32>
    %cst_76 = arith.constant 5.000000e+00 : f32
    %232 = vector.broadcast %cst_76 : f32 to vector<20x24xf32>
    %233 = arith.cmpf olt, %197, %232 : vector<20x24xf32>
    %234 = arith.select %233, %222, %118 : vector<20x24xi1>, vector<20x24xf32>
    %235 = arith.select %231, %204, %234 : vector<20x24xi1>, vector<20x24xf32>
    %236 = arith.select %229, %204, %235 : vector<20x24xi1>, vector<20x24xf32>
    %237 = arith.select %227, %212, %236 : vector<20x24xi1>, vector<20x24xf32>
    %238 = arith.select %225, %118, %237 : vector<20x24xi1>, vector<20x24xf32>
    %239 = vector.broadcast %9 : f32 to vector<20x24xf32>
    %240 = arith.mulf %239, %238 : vector<20x24xf32>
    %241 = vector.broadcast %223 : f32 to vector<20x24xf32>
    %242 = arith.mulf %241, %96 : vector<20x24xf32>
    %243 = arith.addf %240, %242 : vector<20x24xf32>
    %cst_77 = arith.constant 1.000000e+00 : f32
    %244 = vector.broadcast %cst_77 : f32 to vector<20x24xf32>
    %245 = arith.cmpf olt, %197, %244 : vector<20x24xf32>
    %cst_78 = arith.constant 2.000000e+00 : f32
    %246 = vector.broadcast %cst_78 : f32 to vector<20x24xf32>
    %247 = arith.cmpf olt, %197, %246 : vector<20x24xf32>
    %cst_79 = arith.constant 3.000000e+00 : f32
    %248 = vector.broadcast %cst_79 : f32 to vector<20x24xf32>
    %249 = arith.cmpf olt, %197, %248 : vector<20x24xf32>
    %cst_80 = arith.constant 4.000000e+00 : f32
    %250 = vector.broadcast %cst_80 : f32 to vector<20x24xf32>
    %251 = arith.cmpf olt, %197, %250 : vector<20x24xf32>
    %cst_81 = arith.constant 5.000000e+00 : f32
    %252 = vector.broadcast %cst_81 : f32 to vector<20x24xf32>
    %253 = arith.cmpf olt, %197, %252 : vector<20x24xf32>
    %254 = arith.select %253, %204, %204 : vector<20x24xi1>, vector<20x24xf32>
    %255 = arith.select %251, %212, %254 : vector<20x24xi1>, vector<20x24xf32>
    %256 = arith.select %249, %118, %255 : vector<20x24xi1>, vector<20x24xf32>
    %257 = arith.select %247, %118, %256 : vector<20x24xi1>, vector<20x24xf32>
    %258 = arith.select %245, %222, %257 : vector<20x24xi1>, vector<20x24xf32>
    %259 = vector.broadcast %9 : f32 to vector<20x24xf32>
    %260 = arith.mulf %259, %258 : vector<20x24xf32>
    %261 = vector.broadcast %223 : f32 to vector<20x24xf32>
    %262 = arith.mulf %261, %106 : vector<20x24xf32>
    %263 = arith.addf %260, %262 : vector<20x24xf32>
    %cst_82 = arith.constant 1.000000e+00 : f32
    %264 = vector.broadcast %cst_82 : f32 to vector<20x24xf32>
    %265 = arith.cmpf olt, %197, %264 : vector<20x24xf32>
    %cst_83 = arith.constant 2.000000e+00 : f32
    %266 = vector.broadcast %cst_83 : f32 to vector<20x24xf32>
    %267 = arith.cmpf olt, %197, %266 : vector<20x24xf32>
    %cst_84 = arith.constant 3.000000e+00 : f32
    %268 = vector.broadcast %cst_84 : f32 to vector<20x24xf32>
    %269 = arith.cmpf olt, %197, %268 : vector<20x24xf32>
    %cst_85 = arith.constant 4.000000e+00 : f32
    %270 = vector.broadcast %cst_85 : f32 to vector<20x24xf32>
    %271 = arith.cmpf olt, %197, %270 : vector<20x24xf32>
    %cst_86 = arith.constant 5.000000e+00 : f32
    %272 = vector.broadcast %cst_86 : f32 to vector<20x24xf32>
    %273 = arith.cmpf olt, %197, %272 : vector<20x24xf32>
    %274 = arith.select %273, %118, %212 : vector<20x24xi1>, vector<20x24xf32>
    %275 = arith.select %271, %118, %274 : vector<20x24xi1>, vector<20x24xf32>
    %276 = arith.select %269, %222, %275 : vector<20x24xi1>, vector<20x24xf32>
    %277 = arith.select %267, %204, %276 : vector<20x24xi1>, vector<20x24xf32>
    %278 = arith.select %265, %204, %277 : vector<20x24xi1>, vector<20x24xf32>
    %279 = vector.broadcast %9 : f32 to vector<20x24xf32>
    %280 = arith.mulf %279, %278 : vector<20x24xf32>
    %281 = vector.broadcast %223 : f32 to vector<20x24xf32>
    %282 = arith.mulf %281, %116 : vector<20x24xf32>
    %283 = arith.addf %280, %282 : vector<20x24xf32>
    %cst_87 = arith.constant 2.989000e-01 : f32
    %284 = vector.broadcast %cst_87 : f32 to vector<20x24xf32>
    %285 = arith.mulf %284, %243 : vector<20x24xf32>
    %cst_88 = arith.constant 5.870000e-01 : f32
    %286 = vector.broadcast %cst_88 : f32 to vector<20x24xf32>
    %287 = arith.mulf %286, %263 : vector<20x24xf32>
    %288 = arith.addf %285, %287 : vector<20x24xf32>
    %cst_89 = arith.constant 1.140000e-01 : f32
    %289 = vector.broadcast %cst_89 : f32 to vector<20x24xf32>
    %290 = arith.mulf %289, %283 : vector<20x24xf32>
    %291 = arith.addf %288, %290 : vector<20x24xf32>
    %292 = vector.shape_cast %291 : vector<20x24xf32> to vector<1x20x24xf32>
    %cst_90 = arith.constant dense<0.000000e+00> : vector<1xf32>
    %293 = vector.multi_reduction <add>, %292, %cst_90 [1, 2] : vector<1x20x24xf32> to vector<1xf32>
    %294 = vector.shape_cast %293 : vector<1xf32> to vector<1x1x1xf32>
    %295 = vector.extract %294[0, 0, 0] : f32 from vector<1x1x1xf32>
    %cst_91 = arith.constant 4.800000e+02 : f32
    %296 = arith.divf %295, %cst_91 : f32
    %297 = vector.broadcast %11 : f32 to vector<20x24xf32>
    %298 = arith.mulf %297, %243 : vector<20x24xf32>
    %cst_92 = arith.constant 1.000000e+00 : f32
    %299 = arith.subf %cst_92, %11 : f32
    %300 = arith.mulf %299, %296 : f32
    %301 = vector.broadcast %300 : f32 to vector<20x24xf32>
    %302 = arith.addf %298, %301 : vector<20x24xf32>
    %cst_93 = arith.constant 0.000000e+00 : f32
    %cst_94 = arith.constant 1.000000e+00 : f32
    %303 = vector.broadcast %cst_93 : f32 to vector<20x24xf32>
    %304 = arith.maximumf %303, %302 : vector<20x24xf32>
    %305 = vector.broadcast %cst_94 : f32 to vector<20x24xf32>
    %306 = arith.minimumf %305, %304 : vector<20x24xf32>
    %307 = vector.broadcast %11 : f32 to vector<20x24xf32>
    %308 = arith.mulf %307, %263 : vector<20x24xf32>
    %cst_95 = arith.constant 1.000000e+00 : f32
    %309 = arith.subf %cst_95, %11 : f32
    %310 = arith.mulf %309, %296 : f32
    %311 = vector.broadcast %310 : f32 to vector<20x24xf32>
    %312 = arith.addf %308, %311 : vector<20x24xf32>
    %cst_96 = arith.constant 0.000000e+00 : f32
    %cst_97 = arith.constant 1.000000e+00 : f32
    %313 = vector.broadcast %cst_96 : f32 to vector<20x24xf32>
    %314 = arith.maximumf %313, %312 : vector<20x24xf32>
    %315 = vector.broadcast %cst_97 : f32 to vector<20x24xf32>
    %316 = arith.minimumf %315, %314 : vector<20x24xf32>
    %317 = vector.broadcast %11 : f32 to vector<20x24xf32>
    %318 = arith.mulf %317, %283 : vector<20x24xf32>
    %cst_98 = arith.constant 1.000000e+00 : f32
    %319 = arith.subf %cst_98, %11 : f32
    %320 = arith.mulf %319, %296 : f32
    %321 = vector.broadcast %320 : f32 to vector<20x24xf32>
    %322 = arith.addf %318, %321 : vector<20x24xf32>
    %cst_99 = arith.constant 0.000000e+00 : f32
    %cst_100 = arith.constant 1.000000e+00 : f32
    %323 = vector.broadcast %cst_99 : f32 to vector<20x24xf32>
    %324 = arith.maximumf %323, %322 : vector<20x24xf32>
    %325 = vector.broadcast %cst_100 : f32 to vector<20x24xf32>
    %326 = arith.minimumf %325, %324 : vector<20x24xf32>
    %c0_101 = arith.constant 0 : index
    %c0_102 = arith.constant 0 : index
    %c0_103 = arith.constant 0 : index
    %327 = vector.load %arg4[%c0_101, %c0_102, %c0_103] : memref<1x16x20xf32, #tpu.memory_space<vmem>>, vector<1x16x20xf32>
    %328 = vector.shape_cast %327 : vector<1x16x20xf32> to vector<16x20xf32>
    %c0_104 = arith.constant 0 : index
    %c0_105 = arith.constant 0 : index
    %c0_106 = arith.constant 0 : index
    %329 = vector.load %arg5[%c0_104, %c0_105, %c0_106] : memref<1x24x16xf32, #tpu.memory_space<vmem>>, vector<1x24x16xf32>
    %330 = vector.shape_cast %329 : vector<1x24x16xf32> to vector<24x16xf32>
    %331 = tpu.concatenate %306, %316, %326 in 1 : vector<20x24xf32>, vector<20x24xf32>, vector<20x24xf32> -> vector<20x72xf32>
    %cst_107 = arith.constant dense<0.000000e+00> : vector<16x72xf32>
    %332 = tpu.matmul %328, %331, %cst_107 {dimension_numbers = #tpu.dot_dimension_numbers<[1], [0], [0], [1], [0, 0, 1, 1], [], []>} : vector<16x20xf32>, vector<20x72xf32>, vector<16x72xf32> -> vector<16x72xf32>
    %333 = vector.extract_strided_slice %332 {offsets = [0, 0], sizes = [16, 24], strides = [1, 1]} : vector<16x72xf32> to vector<16x24xf32>
    %cst_108 = arith.constant dense<0.000000e+00> : vector<16x16xf32>
    %334 = tpu.matmul %333, %330, %cst_108 {dimension_numbers = #tpu.dot_dimension_numbers<[1], [0], [0], [1], [0, 0, 1, 1], [], []>} : vector<16x24xf32>, vector<24x16xf32>, vector<16x16xf32> -> vector<16x16xf32>
    %335 = vector.extract_strided_slice %332 {offsets = [0, 24], sizes = [16, 24], strides = [1, 1]} : vector<16x72xf32> to vector<16x24xf32>
    %cst_109 = arith.constant dense<0.000000e+00> : vector<16x16xf32>
    %336 = tpu.matmul %335, %330, %cst_109 {dimension_numbers = #tpu.dot_dimension_numbers<[1], [0], [0], [1], [0, 0, 1, 1], [], []>} : vector<16x24xf32>, vector<24x16xf32>, vector<16x16xf32> -> vector<16x16xf32>
    %337 = vector.extract_strided_slice %332 {offsets = [0, 48], sizes = [16, 24], strides = [1, 1]} : vector<16x72xf32> to vector<16x24xf32>
    %cst_110 = arith.constant dense<0.000000e+00> : vector<16x16xf32>
    %338 = tpu.matmul %337, %330, %cst_110 {dimension_numbers = #tpu.dot_dimension_numbers<[1], [0], [0], [1], [0, 0, 1, 1], [], []>} : vector<16x24xf32>, vector<24x16xf32>, vector<16x16xf32> -> vector<16x16xf32>
    %c0_111 = arith.constant 0 : index
    %c0_112 = arith.constant 0 : index
    %c0_113 = arith.constant 0 : index
    %339 = vector.load %arg6[%c0_111, %c0_112, %c0_113] : memref<1x16x20xf32, #tpu.memory_space<vmem>>, vector<1x16x20xf32>
    %340 = vector.shape_cast %339 : vector<1x16x20xf32> to vector<16x20xf32>
    %c0_114 = arith.constant 0 : index
    %c0_115 = arith.constant 0 : index
    %c0_116 = arith.constant 0 : index
    %341 = vector.load %arg7[%c0_114, %c0_115, %c0_116] : memref<1x24x16xf32, #tpu.memory_space<vmem>>, vector<1x24x16xf32>
    %342 = vector.shape_cast %341 : vector<1x24x16xf32> to vector<24x16xf32>
    %c0_117 = arith.constant 0 : index
    %c0_118 = arith.constant 0 : index
    %343 = vector.load %arg3[%c0_117, %c0_118] : memref<20x72xf32, #tpu.memory_space<vmem>>, vector<20x72xf32>
    %cst_119 = arith.constant dense<0.000000e+00> : vector<16x72xf32>
    %344 = tpu.matmul %340, %343, %cst_119 {dimension_numbers = #tpu.dot_dimension_numbers<[1], [0], [0], [1], [0, 0, 1, 1], [], []>} : vector<16x20xf32>, vector<20x72xf32>, vector<16x72xf32> -> vector<16x72xf32>
    %345 = vector.extract_strided_slice %344 {offsets = [0, 0], sizes = [16, 24], strides = [1, 1]} : vector<16x72xf32> to vector<16x24xf32>
    %cst_120 = arith.constant dense<0.000000e+00> : vector<16x16xf32>
    %346 = tpu.matmul %345, %342, %cst_120 {dimension_numbers = #tpu.dot_dimension_numbers<[1], [0], [0], [1], [0, 0, 1, 1], [], []>} : vector<16x24xf32>, vector<24x16xf32>, vector<16x16xf32> -> vector<16x16xf32>
    %347 = vector.extract_strided_slice %344 {offsets = [0, 24], sizes = [16, 24], strides = [1, 1]} : vector<16x72xf32> to vector<16x24xf32>
    %cst_121 = arith.constant dense<0.000000e+00> : vector<16x16xf32>
    %348 = tpu.matmul %347, %342, %cst_121 {dimension_numbers = #tpu.dot_dimension_numbers<[1], [0], [0], [1], [0, 0, 1, 1], [], []>} : vector<16x24xf32>, vector<24x16xf32>, vector<16x16xf32> -> vector<16x16xf32>
    %349 = vector.extract_strided_slice %344 {offsets = [0, 48], sizes = [16, 24], strides = [1, 1]} : vector<16x72xf32> to vector<16x24xf32>
    %cst_122 = arith.constant dense<0.000000e+00> : vector<16x16xf32>
    %350 = tpu.matmul %349, %342, %cst_122 {dimension_numbers = #tpu.dot_dimension_numbers<[1], [0], [0], [1], [0, 0, 1, 1], [], []>} : vector<16x24xf32>, vector<24x16xf32>, vector<16x16xf32> -> vector<16x16xf32>
    %cst_123 = arith.constant 0.000000e+00 : f32
    %351 = vector.broadcast %cst_123 : f32 to vector<16x32xf32>
    %352 = tpu.concatenate %334, %336, %338, %346, %348, %350, %351 in 1 : vector<16x16xf32>, vector<16x16xf32>, vector<16x16xf32>, vector<16x16xf32>, vector<16x16xf32>, vector<16x16xf32>, vector<16x32xf32> -> vector<16x128xf32>
    %c0_124 = arith.constant 0 : index
    %c0_125 = arith.constant 0 : index
    %c0_126 = arith.constant 0 : index
    %353 = vector.load %arg8[%c0_124, %c0_125, %c0_126] : memref<1x16x128xf32, #tpu.memory_space<vmem>>, vector<1x16x128xf32>
    %354 = vector.shape_cast %353 : vector<1x16x128xf32> to vector<16x128xf32>
    %355 = vector.shape_cast %352 : vector<16x128xf32> to vector<1x16x128xf32>
    tpu.vector_store %arg8[%c0_124, %c0_125, %c0_126], %355 {strides = array<i32>} : memref<1x16x128xf32, #tpu.memory_space<vmem>>, vector<1x16x128xf32>,
    %356 = tpu.iota {dimensions = array<i32: 1>} : vector<8x128xi32>
    %cst_127 = arith.constant 0.000000e+00 : f32
    %357 = vector.broadcast %cst_127 : f32 to vector<8x128xf32>
    %c0_i32 = arith.constant 0 : i32
    %358 = vector.broadcast %c0_i32 : i32 to vector<8x128xi32>
    %359 = arith.cmpi eq, %356, %358 : vector<8x128xi32>
    %360 = arith.extui %359 : vector<8x128xi1> to vector<8x128xi32>
    %361 = arith.sitofp %360 : vector<8x128xi32> to vector<8x128xf32>
    %362 = vector.shape_cast %346 : vector<16x16xf32> to vector<1x16x16xf32>
    %cst_128 = arith.constant dense<0xFF800000> : vector<1xf32>
    %363 = vector.multi_reduction <maximumf>, %362, %cst_128 [1, 2] : vector<1x16x16xf32> to vector<1xf32>
    %364 = vector.shape_cast %363 : vector<1xf32> to vector<1x1x1xf32>
    %365 = vector.extract %364[0, 0, 0] : f32 from vector<1x1x1xf32>
    %366 = vector.broadcast %365 : f32 to vector<8x128xf32>
    %367 = arith.mulf %361, %366 : vector<8x128xf32>
    %368 = arith.addf %357, %367 : vector<8x128xf32>
    %c1_i32 = arith.constant 1 : i32
    %369 = vector.broadcast %c1_i32 : i32 to vector<8x128xi32>
    %370 = arith.cmpi eq, %356, %369 : vector<8x128xi32>
    %371 = arith.extui %370 : vector<8x128xi1> to vector<8x128xi32>
    %372 = arith.sitofp %371 : vector<8x128xi32> to vector<8x128xf32>
    %373 = vector.shape_cast %348 : vector<16x16xf32> to vector<1x16x16xf32>
    %cst_129 = arith.constant dense<0xFF800000> : vector<1xf32>
    %374 = vector.multi_reduction <maximumf>, %373, %cst_129 [1, 2] : vector<1x16x16xf32> to vector<1xf32>
    %375 = vector.shape_cast %374 : vector<1xf32> to vector<1x1x1xf32>
    %376 = vector.extract %375[0, 0, 0] : f32 from vector<1x1x1xf32>
    %377 = vector.broadcast %376 : f32 to vector<8x128xf32>
    %378 = arith.mulf %372, %377 : vector<8x128xf32>
    %379 = arith.addf %368, %378 : vector<8x128xf32>
    %c2_i32 = arith.constant 2 : i32
    %380 = vector.broadcast %c2_i32 : i32 to vector<8x128xi32>
    %381 = arith.cmpi eq, %356, %380 : vector<8x128xi32>
    %382 = arith.extui %381 : vector<8x128xi1> to vector<8x128xi32>
    %383 = arith.sitofp %382 : vector<8x128xi32> to vector<8x128xf32>
    %384 = vector.shape_cast %350 : vector<16x16xf32> to vector<1x16x16xf32>
    %cst_130 = arith.constant dense<0xFF800000> : vector<1xf32>
    %385 = vector.multi_reduction <maximumf>, %384, %cst_130 [1, 2] : vector<1x16x16xf32> to vector<1xf32>
    %386 = vector.shape_cast %385 : vector<1xf32> to vector<1x1x1xf32>
    %387 = vector.extract %386[0, 0, 0] : f32 from vector<1x1x1xf32>
    %388 = vector.broadcast %387 : f32 to vector<8x128xf32>
    %389 = arith.mulf %383, %388 : vector<8x128xf32>
    %390 = arith.addf %379, %389 : vector<8x128xf32>
    %cst_131 = arith.constant 5.000000e-01 : f32
    %391 = vector.broadcast %cst_131 : f32 to vector<8x128xf32>
    %392 = arith.cmpf ogt, %390, %391 : vector<8x128xf32>
    %393 = arith.extui %392 : vector<8x128xi1> to vector<8x128xi32>
    %c0_132 = arith.constant 0 : index
    %c0_133 = arith.constant 0 : index
    %c0_134 = arith.constant 0 : index
    %394 = vector.load %arg9[%c0_132, %c0_133, %c0_134] : memref<1x8x128xi32, #tpu.memory_space<vmem>>, vector<1x8x128xi32>
    %395 = vector.shape_cast %394 : vector<1x8x128xi32> to vector<8x128xi32>
    %396 = vector.shape_cast %393 : vector<8x128xi32> to vector<1x8x128xi32>
    tpu.vector_store %arg9[%c0_132, %c0_133, %c0_134], %396 {strides = array<i32>} : memref<1x8x128xi32, #tpu.memory_space<vmem>>, vector<1x8x128xi32>,
    return
  }
  func.func @transform_0(%arg0: i32) -> (i32, i32) {
    %c0_i32 = arith.constant 0 : i32
    %c0_i32_0 = arith.constant 0 : i32
    %c0_i32_1 = arith.constant 0 : i32
    return %c0_i32, %c0_i32_0 : i32, i32
  }
  func.func @transform_1(%arg0: i32) -> (i32, i32, i32) {
    %c0_i32 = arith.constant 0 : i32
    %c0_i32_0 = arith.constant 0 : i32
    %c0_i32_1 = arith.constant 0 : i32
    %c0_i32_2 = arith.constant 0 : i32
    return %c0_i32, %c0_i32_0, %c0_i32_1 : i32, i32, i32
  }
  func.func @transform_2(%arg0: i32) -> (i32, i32) {
    %c0_i32 = arith.constant 0 : i32
    %c0_i32_0 = arith.constant 0 : i32
    %c0_i32_1 = arith.constant 0 : i32
    return %c0_i32, %c0_i32_0 : i32, i32
  }
  func.func @transform_3(%arg0: i32) -> (i32, i32, i32) {
    %c0_i32 = arith.constant 0 : i32
    %c0_i32_0 = arith.constant 0 : i32
    %c0_i32_1 = arith.constant 0 : i32
    return %arg0, %c0_i32, %c0_i32_0 : i32, i32, i32
  }
  func.func @transform_4(%arg0: i32) -> (i32, i32, i32) {
    %c0_i32 = arith.constant 0 : i32
    %c0_i32_0 = arith.constant 0 : i32
    %c0_i32_1 = arith.constant 0 : i32
    return %arg0, %c0_i32, %c0_i32_0 : i32, i32, i32
  }
  func.func @transform_5(%arg0: i32) -> (i32, i32, i32) {
    %c0_i32 = arith.constant 0 : i32
    %c0_i32_0 = arith.constant 0 : i32
    %c0_i32_1 = arith.constant 0 : i32
    return %arg0, %c0_i32, %c0_i32_0 : i32, i32, i32
  }
  func.func @transform_6(%arg0: i32) -> (i32, i32, i32) {
    %c0_i32 = arith.constant 0 : i32
    %c0_i32_0 = arith.constant 0 : i32
    %c0_i32_1 = arith.constant 0 : i32
    return %arg0, %c0_i32, %c0_i32_0 : i32, i32, i32
  }
  func.func @transform_7(%arg0: i32) -> (i32, i32, i32) {
    %c0_i32 = arith.constant 0 : i32
    %c0_i32_0 = arith.constant 0 : i32
    %c0_i32_1 = arith.constant 0 : i32
    return %arg0, %c0_i32, %c0_i32_0 : i32, i32, i32
  }
  func.func @transform_8(%arg0: i32) -> (i32, i32, i32) {
    %c0_i32 = arith.constant 0 : i32
    %c0_i32_0 = arith.constant 0 : i32
    %c0_i32_1 = arith.constant 0 : i32
    return %arg0, %c0_i32, %c0_i32_0 : i32, i32, i32
  }
}

</mosaic_0001>

<bundles_post_ra>
// kernel: tpu_custom_call.1
= control target key start
LH: loop header
LB: loop body
LE: loop exit
PB: predicated region body
PF: predicated region fallthrough
CT: control target
= control target key end

     0   :  { %s3089_s0 = inlined_call_operand.vmem [shape: f32[8,8], index: 0, kind: input, shape index: {}]   ;;  %s3090_s1 = inlined_call_operand.vmem [shape: f32[3,20,24], index: 1, kind: input, shape index: {}]   ;;  %s3091_s2 = inlined_call_operand.vmem [shape: f32[20,72], index: 2, kind: input, shape index: {}]   ;;  %s3092_s3 = inlined_call_operand.vmem [shape: f32[8,16,20], index: 3, kind: input, shape index: {}]   ;;  %s3093_s4 = inlined_call_operand.vmem [shape: f32[8,24,16], index: 4, kind: input, shape index: {}]   ;;  %s3094_s5 = inlined_call_operand.vmem [shape: f32[8,16,20], index: 5, kind: input, shape index: {}]   ;;  %s3095_s6 = inlined_call_operand.vmem [shape: f32[8,24,16], index: 6, kind: input, shape index: {}]   ;;  %s3096_s7 = inlined_call_operand.hbm [shape: f32[8,16,128], index: 7, kind: output, shape index: {0}]   ;;  %s3097_s8 = inlined_call_operand.hbm [shape: s32[8,8,128], index: 8, kind: output, shape index: {1}]  }
   0x1   :  { %3100 = sst [smem:[#allocation11_spill]] %s3089_s0 }
   0x2   :  { %14 = vsyncpa [#allocation4], 0 }
   0x3   :  { %15 = vsyncpa [#allocation3], 0 }
   0x4   :  { %17 = vsyncpa [#allocation3 + $0x1], 0 }
   0x5   :  { %18 = vsyncpa [#allocation7], 0 }
   0x6   :  { %20 = vsyncpa [#allocation7 + $0x1], 0  ;;  %s2421_s27 = smov 0   ;;  %s2423_s28 = smov 0  }
   0x7   :  { %s2425_s29 = smov 0   ;;  %s2427_s30 = smov 0  }
   0x8 LB: > { %s2442_s9 = sadd.s32 4294967295, %s2359_s30   ;;  %s1993_s10 = sadd.s32 4294967294, %s2359_s30   ;;  %s2359_s30 = sphi %s2427_s30, %s3138_s30   ;;  %s2355_s29 = sphi %s2425_s29, %s3137_s29   ;;  %s2351_s28 = sphi %s2423_s28, %s3136_s28   ;;  %s2347_s27 = sphi %s2421_s27, %s3135_s27  }
   0x9   : > { %s2446_s11 = sadd.s32 1, %s2359_s30   ;;  %s200_s12 = sadd.s32 1, %s2355_s29 }
   0xa   : > { %s197_s13 = ssub.s32 %s2359_s30, %s2446_s11  ;;  %p210_p0 = scmp.ne.s32.totalorder %s2355_s29, %s2351_s28 }
   0xb   : > { %p198_p1 = scmp.eq.s32.totalorder %s197_s13, 0  ;;  %p211_p2 = scmp.eq.s32.totalorder %s2442_s9, 7 }
   0xc   : > { %p216_p3 = scmp.ne.s32.totalorder %s2351_s28, %s2347_s27  ;;  %p217_p4 = scmp.eq.s32.totalorder %s1993_s10, 7 }
   0xd   : > { %s2457_s14 = scalar_select %p198_p1, %s2355_s29, %s200_s12  }
   0xe   : > { %p2459_p5 = por %p211_p2, %p210_p0  ;;  %p2463_p6 = por %p217_p4, %p216_p3 }
   0xf   : > { %p1994_p7 = scmp.ge.s32.totalorder %s2359_s30, 1  ;;  %p250_p8 = scmp.lt.s32.totalorder %s2359_s30, 9 }
  0x10   : > { %p2190_p9 = scmp.eq.s32.totalorder %s2442_s9, 0  ;;  %s3104_s0 = sld [smem:[#allocation11_spill]] }
  0x11   : > { %p2470_p10 = pnand %p1994_p7, %p250_p8 }
  0x13   : > { %p2179_p11 = pneg %p2470_p10 }
  0x15   : > { %p2180_p12 = pnand %p2190_p9, %p2179_p11 }
  0x16   : > { %s263_s20 = sshll.u32 %s3104_s0, 4  ;;  %s264_s20 = int_to_ptr.vmem [resolvable:$true] %s263_s20 }
  0x17   : > { %s2250_s21 = scalar_lea.vmem %s264_s20, 128  ;;  %p2252_p0 = pneg %p2180_p12 }
  0x18   : > { %p2251_p13 = scmp.ne.s32.totalorder %s264_s20, %s2250_s21  ;;  %p2258_p3 = scmp.lt.s32.totalorder %s264_s20, %s264_s20 }
  0x19   : > { %p2259_p4 = scmp.lt.s32.totalorder %s2250_s21, %s2250_s21 }
  0x1a   : > { %p2253_p1 = pnand %p2252_p0, %p2251_p13 }
  0x1b   : > { %p2260_p7 = por %p2259_p4, %p2258_p3 }
  0x1c   : > { %p2254_p2 = pneg %p2253_p1 }
  0x1e   : > { %p2261_p8 = pnand %p2260_p7, %p2254_p2 }
  0x20   : > { %2264 = shalt.err (!%p2261_p8)
}
  0x21   : > { %s2361_s22 = smov [#allocation2]   ;;  %314 = sbr.rel (%p2470_p10) target bundleno = 1813 (0x715), region = 48 }
  0x22   : > { %2182 = dma.vmem_to_smem (!%p2180_p12), %s264_s20, 128, %s2361_s22, [#allocation4]  }
  0x26   : > { %2334 = dma.done.wait (%p2190_p9), [#allocation4], 128  }
  0x27   : > { %2336 = vsyncadd (%p2190_p9), [#allocation4], 4294967168 }
  0x28   : > { %320 = sfence }
  0x29   : > { %s2488_s23 = sshll.u32 %s2442_s9, 7  ;;  %v401_v0 = vld [vmem:[%s3090_s1] sm:$0xff]  ;;  %v402_v1 = vld [vmem:[%s3090_s1 + $0x8] sm:$0xff]  ;;  %v403_v2 = vld [vmem:[%s3090_s1 + $0x10] sm:$0xf]  ;;  %vm3099_vm0 = vcmask 195584  }
  0x2a   : > { %s390_s24 = sld [smem:[#allocation2 + %s2488_s23]]  ;;  %v2008_v3 = vld [vmem:[%s3090_s1 + $0x18] sm:$0xff]  ;;  %v2009_v4 = vld [vmem:[%s3090_s1 + $0x20] sm:$0xff]  ;;  %v2010_v5 = vld [vmem:[%s3090_s1 + $0x28] sm:$0xf]  ;;  %vm3098_vm1 = vcmask 191488  }
  0x2b   : > { %v2011_v6 = vld [vmem:[%s3090_s1 + $0x30] sm:$0xff]  ;;  %v2012_v7 = vld [vmem:[%s3090_s1 + $0x38] sm:$0xff]  ;;  %v2013_v9 = vld [vmem:[%s3090_s1 + $0x40] sm:$0xf]  ;;  %s391_s0 = sadd.s32 1, %s2488_s23  ;;  %s393_s21 = sadd.s32 2, %s2488_s23 }
  0x2c   : > { %s2523_s25 = sld [smem:[#allocation2 + %s393_s21]]  ;;  %vm2362_vm9 = vmmov 1   ;;  %s395_s10 = sadd.s32 3, %s2488_s23 }
  0x2d   : > { %s396_s12 = sld [smem:[#allocation2 + %s395_s10]]  ;;  %s397_s13 = sadd.s32 4, %s2488_s23 }
  0x2e   : > { %s2676_s17 = sld [smem:[#allocation2 + %s397_s13]]  ;;  %p369_p9 = scmp.lt.s32.totalorder %s2442_s9, 7 }
  0x30   : > { %v412_v8 = vstv %s390_s24  ;;  %s392_s24 = sld [smem:[#allocation2 + %s391_s0]] }
  0x31   : > { %v413_v10 = vmul.f32 %v412_v8, %v401_v0  ;;  %v414_v11 = vmul.f32 %v412_v8, %v402_v1  ;;  %v415_v12 = vmul.f32 %v412_v8, %v403_v2  ;;  %v422_v13 = vmul.f32 %v2008_v3, %v412_v8  ;;  %s2904_s10 = scalar_select %p369_p9, %s2442_s9, 7 }
  0x32   : > { %v423_v14 = vmul.f32 %v2009_v4, %v412_v8  ;;  %v424_v15 = vmul.f32 %v2010_v5, %v412_v8  ;;  %v431_v16 = vmul.f32 %v2011_v6, %v412_v8  ;;  %v432_v17 = vmul.f32 %v2012_v7, %v412_v8  ;;  %s533_s26 = ssub.f32 1.0, %s2523_s25 }
  0x33   : > { %v416_v18 = vmax.f32 %v413_v10, 0.0  ;;  %v417_v19 = vmax.f32 %v414_v11, 0.0  ;;  %v418_v20 = vmax.f32 %v415_v12, 0.0  ;;  %v425_v21 = vmax.f32 %v422_v13, 0.0  ;;  %s2160_s13 = smul.u32 24, %s2904_s10 }
  0x34   : > { %v426_v22 = vmax.f32 %v423_v14, 0.0  ;;  %v427_v23 = vmax.f32 %v424_v15, 0.0  ;;  %v433_v24 = vmul.f32 %v2013_v9, %v412_v8  ;;  %v434_v25 = vmax.f32 %v431_v16, 0.0  ;;  %s834_s0 = ssub.f32 1.0, %s2676_s17 }
  0x35   : > { %v419_v26 = vmin.f32 %v416_v18, 1.0  ;;  %v420_v27 = vmin.f32 %v417_v19, 1.0  ;;  %v421_v28 = vmin.f32 %v418_v20, 1.0  ;;  %v428_v29 = vmin.f32 %v425_v21, 1.0 }
  0x36   : > { %v429_v30 = vmin.f32 %v426_v22, 1.0  ;;  %v430_v31 = vmin.f32 %v427_v23, 1.0  ;;  %v435_v32 = vmax.f32 %v432_v17, 0.0  ;;  %v436_v33 = vmax.f32 %v433_v24, 0.0  ;;  %s478_s18 = ssub.f32 1.0, %s392_s24 }
  0x37   : > { %v437_v34 = vmin.f32 %v434_v25, 1.0  ;;  %v440_v35 = vmul.f32 0.2989, %v419_v26  ;;  %v441_v36 = vmul.f32 0.2989, %v420_v27  ;;  %v474_v0 = vstv %s392_s24  ;;  %s399_s24 = sadd.s32 5, %s2488_s23 }
  0x38   : > { %v438_v37 = vmin.f32 %v435_v32, 1.0  ;;  %v439_v38 = vmin.f32 %v436_v33, 1.0  ;;  %v442_v39 = vmul.f32 0.2989, %v421_v28  ;;  %v443_v40 = vmul.f32 0.587, %v428_v29 }
  0x39   : > { %v444_v41 = vmul.f32 0.587, %v429_v30  ;;  %v445_v42 = vmul.f32 0.587, %v430_v31  ;;  %v449_v43 = vmul.f32 0.114, %v437_v34  ;;  %v475_v1 = vmul.f32 %v474_v0, %v419_v26 }
  0x3a   : > { %v446_v44 = vadd.f32 %v443_v40, %v440_v35  ;;  %v450_v45 = vmul.f32 0.114, %v438_v37  ;;  %v451_v46 = vmul.f32 0.114, %v439_v38  ;;  %v476_v2 = vmul.f32 %v474_v0, %v420_v27 }
  0x3b   : > { %v447_v47 = vadd.f32 %v444_v41, %v441_v36  ;;  %v448_v48 = vadd.f32 %v445_v42, %v442_v39  ;;  %v477_v3 = vmul.f32 %v474_v0, %v421_v28  ;;  %v490_v4 = vmul.f32 %v474_v0, %v428_v29 }
  0x3c   : > { %v452_v49 = vadd.f32 %v449_v43, %v446_v44  ;;  %v491_v5 = vmul.f32 %v474_v0, %v429_v30  ;;  %v492_v6 = vmul.f32 %v474_v0, %v430_v31  ;;  %v502_v7 = vmul.f32 %v474_v0, %v437_v34 }
  0x3d   : > { %v453_v50 = vadd.f32 %v450_v45, %v447_v47  ;;  %v454_v51 = vadd.f32 %v451_v46, %v448_v48  ;;  %v503_v8 = vmul.f32 %v474_v0, %v438_v37  ;;  %v504_v9 = vmul.f32 %v474_v0, %v439_v38 }
  0x3e   : > { %v456_v52 = vsel %vm3099_vm0, %v452_v49, 0.0  ;;  %v529_v45 = vstv %s2523_s25  ;;  %v534_v46 = vstv %s533_s26  ;;  %s2363_s25 = smov 24   ;;  %s2364_s26 = smov 48  }
  0x3f   : > { %v457_v53 = vsel %vm3099_vm0, %v453_v50, 0.0  ;;  %v460_v54 = vsel %vm3098_vm1, %v454_v51, 0.0 }
  0x40   : > { %v458_v55 = vadd.f32 %v457_v53, %v456_v52 }
  0x42   : > { %v461_v56 = vadd.f32 %v460_v54, %v458_v55 }
  0x44   : > { %462 = vadd.xlane.f32.xlu0 %v461_v56 }
  0xcd   : > { %v463_v57 = vpop.xlane.xlu0 %462 }
  0xce   : > { %v464_v58 = vrot.slane %v463_v57, 4 }
  0xd0   : > { %v465_v59 = vadd.f32 %v464_v58, %v463_v57 }
  0xd2   : > { %v466_v60 = vrot.slane %v465_v59, 2 }
  0xd4   : > { %v467_v61 = vadd.f32 %v466_v60, %v465_v59 }
  0xd6   : > { %v468_v62 = vrot.slane %v467_v61, 1 }
  0xd8   : > { %v469_v63 = vadd.f32 %v468_v62, %v467_v61 }
  0xda   : > { %2161 = vpush %v469_v63 }
 0x10b   : > { %s2162_s19 = spop %2161 }
 0x10c   : > { %s473_s20 = smul.f32 0.0020833334, %s2162_s19 }
 0x10e   : > { %s479_s22 = smul.f32 %s478_s18, %s473_s20  ;;  %s2848_s18 = sld [smem:[#allocation2 + %s399_s24]] }
 0x110   : > { %v480_v10 = vstv %s479_s22 }
 0x111   : > { %v481_v11 = vadd.f32 %v480_v10, %v475_v1  ;;  %v482_v12 = vadd.f32 %v480_v10, %v476_v2  ;;  %v483_v13 = vadd.f32 %v480_v10, %v477_v3  ;;  %v493_v14 = vadd.f32 %v490_v4, %v480_v10 }
 0x112   : > { %v494_v15 = vadd.f32 %v491_v5, %v480_v10  ;;  %v495_v16 = vadd.f32 %v492_v6, %v480_v10  ;;  %v505_v17 = vadd.f32 %v502_v7, %v480_v10  ;;  %v506_v18 = vadd.f32 %v503_v8, %v480_v10 }
 0x113   : > { %v484_v19 = vmax.f32 %v481_v11, 0.0  ;;  %v485_v20 = vmax.f32 %v482_v12, 0.0  ;;  %v486_v21 = vmax.f32 %v483_v13, 0.0  ;;  %v496_v22 = vmax.f32 %v493_v14, 0.0 }
 0x114   : > { %v497_v23 = vmax.f32 %v494_v15, 0.0  ;;  %v498_v24 = vmax.f32 %v495_v16, 0.0  ;;  %v507_v25 = vadd.f32 %v504_v9, %v480_v10  ;;  %v508_v26 = vmax.f32 %v505_v17, 0.0  ;;  %s957_s19 = ssub.f32 1.0, %s2848_s18 }
 0x115   : > { %v487_v27 = vmin.f32 %v484_v19, 1.0  ;;  %v488_v28 = vmin.f32 %v485_v20, 1.0  ;;  %v489_v29 = vmin.f32 %v486_v21, 1.0  ;;  %v499_v30 = vmin.f32 %v496_v22, 1.0 }
 0x116   : > { %v500_v31 = vmin.f32 %v497_v23, 1.0  ;;  %v501_v32 = vmin.f32 %v498_v24, 1.0  ;;  %v509_v33 = vmax.f32 %v506_v18, 0.0  ;;  %v510_v34 = vmax.f32 %v507_v25, 0.0 }
 0x117   : > { %v511_v35 = vmin.f32 %v508_v26, 1.0  ;;  %v514_v36 = vmul.f32 0.2989, %v487_v27  ;;  %v515_v37 = vmul.f32 0.2989, %v488_v28  ;;  %v530_v52 = vmul.f32 %v529_v45, %v487_v27 }
 0x118   : > { %v512_v38 = vmin.f32 %v509_v33, 1.0  ;;  %v516_v39 = vmul.f32 0.2989, %v489_v29  ;;  %v517_v40 = vmul.f32 0.587, %v499_v30  ;;  %v513_v49 = vmin.f32 %v510_v34, 1.0 }
 0x119   : > { %v518_v41 = vmul.f32 0.587, %v500_v31  ;;  %v519_v42 = vmul.f32 0.587, %v501_v32  ;;  %v523_v44 = vmul.f32 0.114, %v511_v35  ;;  %v531_v53 = vmul.f32 %v529_v45, %v488_v28 }
 0x11a   : > { %v520_v43 = vadd.f32 %v517_v40, %v514_v36  ;;  %v524_v48 = vmul.f32 0.114, %v512_v38  ;;  %v525_v54 = vmul.f32 0.114, %v513_v49  ;;  %v532_v56 = vmul.f32 %v529_v45, %v489_v29 }
 0x11b   : > { %v521_v47 = vadd.f32 %v518_v41, %v515_v37  ;;  %v522_v50 = vadd.f32 %v519_v42, %v516_v39  ;;  %v547_v57 = vmul.f32 %v529_v45, %v499_v30  ;;  %v559_v59 = vmul.f32 %v529_v45, %v511_v35 }
 0x11c   : > { %v526_v51 = vadd.f32 %v523_v44, %v520_v43  ;;  %v548_v60 = vmul.f32 %v529_v45, %v500_v31  ;;  %v560_v63 = vmul.f32 %v529_v45, %v512_v38  ;;  %v549_v0 = vmul.f32 %v529_v45, %v501_v32 }
 0x11d   : > { %v527_v55 = vadd.f32 %v524_v48, %v521_v47  ;;  %v528_v61 = vadd.f32 %v525_v54, %v522_v50  ;;  %v561_v10 = vmul.f32 %v529_v45, %v513_v49 }
 0x11e   : > { %v535_v58 = vmul.f32 %v534_v46, %v526_v51 }
 0x11f   : > { %v536_v62 = vmul.f32 %v534_v46, %v527_v55  ;;  %v537_v4 = vmul.f32 %v534_v46, %v528_v61 }
 0x120   : > { %v538_v1 = vadd.f32 %v535_v58, %v530_v52  ;;  %v550_v2 = vadd.f32 %v547_v57, %v535_v58  ;;  %v562_v3 = vadd.f32 %v559_v59, %v535_v58 }
 0x121   : > { %v539_v5 = vadd.f32 %v536_v62, %v531_v53  ;;  %v551_v6 = vadd.f32 %v548_v60, %v536_v62  ;;  %v563_v7 = vadd.f32 %v560_v63, %v536_v62  ;;  %v540_v12 = vadd.f32 %v537_v4, %v532_v56 }
 0x122   : > { %v541_v8 = vmax.f32 %v538_v1, 0.0  ;;  %v553_v9 = vmax.f32 %v550_v2, 0.0  ;;  %v565_v11 = vmax.f32 %v562_v3, 0.0  ;;  %v552_v14 = vadd.f32 %v549_v0, %v537_v4 }
 0x123   : > { %v542_v13 = vmax.f32 %v539_v5, 0.0  ;;  %v554_v15 = vmax.f32 %v551_v6, 0.0  ;;  %v564_v18 = vadd.f32 %v561_v10, %v537_v4  ;;  %v566_v19 = vmax.f32 %v563_v7, 0.0 }
 0x124   : > { %v2527_v16 = vmin.f32 %v541_v8, 1.0  ;;  %v2529_v17 = vmin.f32 %v553_v9, 1.0  ;;  %v543_v20 = vmax.f32 %v540_v12, 0.0  ;;  %v555_v22 = vmax.f32 %v552_v14, 0.0 }
 0x125   : > { %v2531_v21 = vmin.f32 %v542_v13, 1.0  ;;  %v2533_v23 = vmin.f32 %v554_v15, 1.0  ;;  %v567_v24 = vmax.f32 %v564_v18, 0.0  ;;  %v2535_v25 = vmin.f32 %v565_v11, 1.0 }
 0x126   : > { %v2537_v26 = vmin.f32 %v566_v19, 1.0  ;;  %v571_v27 = vmax.f32 %v2527_v16, %v2529_v17  ;;  %v2541_v28 = vmin.f32 %v543_v20, 1.0  ;;  %v2543_v29 = vmin.f32 %v555_v22, 1.0 }
 0x127   : > { %v572_v30 = vmax.f32 %v2531_v21, %v2533_v23  ;;  %v577_v31 = vmin.f32 %v2527_v16, %v2529_v17  ;;  %v2549_v32 = vmin.f32 %v567_v24, 1.0  ;;  %v578_v34 = vmin.f32 %v2531_v21, %v2533_v23 }
 0x128   : > { %v2552_v33 = vmax.f32 %v571_v27, %v2535_v25  ;;  %v573_v35 = vmax.f32 %v2541_v28, %v2543_v29  ;;  %v579_v37 = vmin.f32 %v2541_v28, %v2543_v29 }
 0x129   : > { %v2559_v36 = vmax.f32 %v572_v30, %v2537_v26  ;;  %v580_v38 = vmin.f32 %v577_v31, %v2535_v25  ;;  %v581_v39 = vmin.f32 %v578_v34, %v2537_v26 }
 0x12a   : > { %v2566_v40 = vmax.f32 %v573_v35, %v2549_v32  ;;  %v582_v41 = vmin.f32 %v579_v37, %v2549_v32  ;;  %vm622_vm5 = vcmp.eq.f32.partialorder %v2552_v33, %v2527_v16  ;;  %vm625_vm8 = vcmp.eq.f32.partialorder %v2552_v33, %v2529_v17 }
 0x12b   : > { %vm583_vm2 = vcmp.eq.f32.partialorder %v2552_v33, %v580_v38  ;;  %v586_v42 = vsub.f32 %v2552_v33, %v580_v38  ;;  %vm584_vm3 = vcmp.eq.f32.partialorder %v2559_v36, %v581_v39  ;;  %v587_v43 = vsub.f32 %v2559_v36, %v581_v39  ;;  %vm628_vm10 = vmxor %vm622_vm5, %vm2362_vm9 }
 0x12c   : > { %v589_v44 = vsel %vm583_vm2, 1.0, %v2552_v33  ;;  %vm585_vm4 = vcmp.eq.f32.partialorder %v2566_v40, %v582_v41  ;;  %v588_v45 = vsub.f32 %v2566_v40, %v582_v41  ;;  %v590_v46 = vsel %vm584_vm3, 1.0, %v2559_v36  ;;  %vm2599_vm15 = vmand %vm625_vm8, %vm628_vm10 }
 0x12d   : > { %2238 = vrcp.f32 %v589_v44  ;;  %v591_v47 = vsel %vm585_vm4, 1.0, %v2566_v40  ;;  %v598_v48 = vsel %vm583_vm2, 1.0, %v586_v42  ;;  %v599_v49 = vsel %vm584_vm3, 1.0, %v587_v43 }
 0x12e   : > { %2240 = vrcp.f32 %v590_v46  ;;  %v600_v50 = vsel %vm585_vm4, 1.0, %v588_v45  ;;  %vm623_vm6 = vcmp.eq.f32.partialorder %v2559_v36, %v2531_v21  ;;  %vm624_vm7 = vcmp.eq.f32.partialorder %v2566_v40, %v2541_v28 }
 0x12f   : > { %2242 = vrcp.f32 %v591_v47  ;;  %vm626_vm11 = vcmp.eq.f32.partialorder %v2559_v36, %v2533_v23  ;;  %vm629_vm12 = vmxor %vm623_vm6, %vm2362_vm9  ;;  %vm627_vm13 = vcmp.eq.f32.partialorder %v2566_v40, %v2543_v29  ;;  %vm634_vm2 = vcmp.ne.f32.partialorder %v2552_v33, %v2529_v17 }
 0x130   : > { %2244 = vrcp.f32 %v598_v48  ;;  %vm630_vm14 = vmxor %vm624_vm7, %vm2362_vm9  ;;  %vm635_vm4 = vcmp.ne.f32.partialorder %v2559_v36, %v2533_v23  ;;  %vm636_vm8 = vcmp.ne.f32.partialorder %v2566_v40, %v2543_v29  ;;  %v601_v60 = vsub.f32 %v2552_v33, %v2527_v16 }
 0x131   : > { %2246 = vrcp.f32 %v599_v49  ;;  %vm2605_vm3 = vmand %vm626_vm11, %vm629_vm12  ;;  %v610_v61 = vsub.f32 %v2552_v33, %v2529_v17  ;;  %v602_v0 = vsub.f32 %v2559_v36, %v2531_v21  ;;  %v603_v1 = vsub.f32 %v2566_v40, %v2541_v28 }
 0x132   : > { %2248 = vrcp.f32 %v600_v50  ;;  %vm2611_vm1 = vmand %vm627_vm13, %vm630_vm14  ;;  %v616_v2 = vsub.f32 %v2552_v33, %v2535_v25  ;;  %v611_v5 = vsub.f32 %v2559_v36, %v2533_v23  ;;  %v612_v6 = vsub.f32 %v2566_v40, %v2543_v29 }
 0x133   : > { %vm2617_vm9 = vmand %vm634_vm2, %vm628_vm10  ;;  %v617_v7 = vsub.f32 %v2559_v36, %v2537_v26  ;;  %v618_v11 = vsub.f32 %v2566_v40, %v2549_v32 }
 0x134   : > { %vm2621_vm0 = vmand %vm635_vm4, %vm629_vm12 }
 0x135   : > { %vm2625_vm11 = vmand %vm636_vm8, %vm630_vm14 }
 0x13a   : > { %v2239_v56 = vpop.eup %2238 }
 0x13b   : > { %v2241_v58 = vpop.eup %2240  ;;  %v2629_v59 = vmul.f32 %v2239_v56, %v586_v42 }
 0x13c   : > { %v2243_v62 = vpop.eup %2242  ;;  %v2635_v63 = vmul.f32 %v2241_v58, %v587_v43 }
 0x13d   : > { %v2245_v3 = vpop.eup %2244  ;;  %v2643_v4 = vmul.f32 %v2243_v62, %v588_v45 }
 0x13e   : > { %v2247_v8 = vpop.eup %2246  ;;  %v605_v9 = vmul.f32 %v2245_v3, %v601_v60  ;;  %v613_v10 = vmul.f32 %v2245_v3, %v610_v61  ;;  %v619_v12 = vmul.f32 %v2245_v3, %v616_v2 }
 0x13f   : > { %v2249_v13 = vpop.eup %2248  ;;  %v607_v14 = vmul.f32 %v2247_v8, %v602_v0  ;;  %v614_v15 = vmul.f32 %v2247_v8, %v611_v5  ;;  %v620_v18 = vmul.f32 %v2247_v8, %v617_v7 }
 0x140   : > { %v609_v19 = vmul.f32 %v2249_v13, %v603_v1  ;;  %v615_v20 = vmul.f32 %v2249_v13, %v612_v6  ;;  %v621_v22 = vmul.f32 %v2249_v13, %v618_v11  ;;  %v640_v24 = vsub.f32 %v619_v12, %v613_v10 }
 0x141   : > { %v641_v27 = vsub.f32 %v620_v18, %v614_v15  ;;  %v646_v30 = vadd.f32 2.0, %v605_v9  ;;  %v647_v31 = vadd.f32 2.0, %v607_v14  ;;  %v658_v34 = vadd.f32 4.0, %v613_v10 }
 0x142   : > { %v642_v35 = vsub.f32 %v621_v22, %v615_v20  ;;  %v643_v37 = vsel %vm622_vm5, %v640_v24, 0.0  ;;  %v648_v38 = vadd.f32 2.0, %v609_v19  ;;  %v659_v39 = vadd.f32 4.0, %v614_v15 }
 0x143   : > { %v644_v41 = vsel %vm623_vm6, %v641_v27, 0.0  ;;  %v649_v42 = vsub.f32 %v646_v30, %v619_v12  ;;  %v650_v43 = vsub.f32 %v647_v31, %v620_v18  ;;  %v660_v44 = vadd.f32 4.0, %v615_v20 }
 0x144   : > { %v645_v45 = vsel %vm624_vm7, %v642_v35, 0.0  ;;  %v651_v46 = vsub.f32 %v648_v38, %v621_v22  ;;  %v661_v47 = vsub.f32 %v658_v34, %v605_v9  ;;  %v662_v48 = vsub.f32 %v659_v39, %v607_v14 }
 0x145   : > { %v652_v49 = vsel %vm2599_vm15, %v649_v42, 0.0  ;;  %v653_v50 = vsel %vm2605_vm3, %v650_v43, 0.0  ;;  %v663_v56 = vsub.f32 %v660_v44, %v609_v19  ;;  %v722_v39 = vstv %s396_s12  ;;  %s2045_s12 = sshll.u32 %s2904_s10, 4  ;;  %s2367_s10 = smov 16  }
 0x146   : > { %v654_v58 = vsel %vm2611_vm1, %v651_v46, 0.0  ;;  %v655_v60 = vadd.f32 %v652_v49, %v643_v37  ;;  %v656_v61 = vadd.f32 %v653_v50, %v644_v41  ;;  %v664_v62 = vsel %vm2617_vm9, %v661_v47, 0.0  ;;  %s2914_s24 = scalar_lea.vmem %s3092_s3, %s2045_s12 }
 0x147   : > { %v657_v0 = vadd.f32 %v654_v58, %v645_v45  ;;  %v665_v1 = vsel %vm2621_vm0, %v662_v48, 0.0  ;;  %v666_v51 = vsel %vm2625_vm11, %v663_v56, 0.0 }
 0x148   : > { %v667_v2 = vadd.f32 %v664_v62, %v655_v60  ;;  %v668_v52 = vadd.f32 %v665_v1, %v656_v61 }
 0x149   : > { %v669_v3 = vadd.f32 %v666_v51, %v657_v0 }
 0x14a   : > { %v671_v5 = vmul.f32 0.16666667, %v667_v2  ;;  %v672_v6 = vmul.f32 0.16666667, %v668_v52  ;;  %v789_v2 = vsub.f32 1.0, %v2629_v59  ;;  %v790_v52 = vsub.f32 1.0, %v2635_v63 }
 0x14b   : > { %v673_v53 = vmul.f32 0.16666667, %v669_v3 }
 0x14c   : > { %v674_v7 = vadd.f32 1.0, %v671_v5  ;;  %v675_v8 = vadd.f32 1.0, %v672_v6 }
 0x14d   : > { %v676_v9 = vadd.f32 1.0, %v673_v53 }
 0x14e   : > { %v677_v10 = vand.u32 2147483647, %v674_v7  ;;  %v687_v54 = vand.u32 2147483647, %v675_v8  ;;  %v685_v19 = vand.u32 2147483648, %v674_v7  ;;  %v695_v27 = vand.u32 2147483648, %v675_v8 }
 0x14f   : > { %v697_v11 = vand.u32 2147483647, %v676_v9  ;;  %v705_v34 = vand.u32 2147483648, %v676_v9 }
 0x150   : > { %v680_v12 = vfloor.f32 %v677_v10  ;;  %v690_v13 = vfloor.f32 %v687_v54 }
 0x151   : > { %v700_v55 = vfloor.f32 %v697_v11 }
 0x152   : > { %v681_v14 = vsub.f32 %v677_v10, %v680_v12  ;;  %v691_v57 = vsub.f32 %v687_v54, %v690_v13  ;;  %v869_v13 = vstv %s834_s0 }
 0x153   : > { %v701_v15 = vsub.f32 %v697_v11, %v700_v55 }
 0x154   : > { %vm682_vm0 = vcmp.eq.f32.partialorder %v681_v14, 1.0  ;;  %vm692_vm1 = vcmp.eq.f32.partialorder %v691_v57, 1.0 }
 0x155   : > { %v683_v18 = vsel %vm682_vm0, 0.0, %v681_v14  ;;  %v693_v20 = vsel %vm692_vm1, 0.0, %v691_v57  ;;  %vm702_vm5 = vcmp.eq.f32.partialorder %v701_v15, 1.0  ;;  %v791_v14 = vsub.f32 1.0, %v2643_v4 }
 0x156   : > { %v684_v22 = vand.u32 2147483647, %v683_v18  ;;  %v694_v24 = vand.u32 2147483647, %v693_v20  ;;  %v703_v30 = vsel %vm702_vm5, 0.0, %v701_v15  ;;  %v792_v57 = vmul.f32 %v789_v2, %v2552_v33 }
 0x157   : > { %v704_v31 = vand.u32 2147483647, %v703_v30  ;;  %v793_v15 = vmul.f32 %v790_v52, %v2559_v36 }
 0x158   : > { %v686_v35 = vor.u32 %v685_v19, %v684_v22  ;;  %v696_v37 = vor.u32 %v695_v27, %v694_v24  ;;  %v2685_v22 = vstv %s2676_s17  ;;  %v2688_v24 = vmul.f32 %v869_v13, %v2527_v16  ;;  %s2366_s17 = smov 104  }
 0x159   : > { %v706_v38 = vor.u32 %v705_v34, %v704_v31  ;;  %v794_v31 = vmul.f32 %v791_v14, %v2566_v40  ;;  %v2692_v34 = vmul.f32 %v869_v13, %v2531_v21  ;;  %v2698_v16 = vmul.f32 %v869_v13, %v2529_v17 }
 0x15a   : > { %vm707_vm6 = vcmp.ne.f32.partialorder %v686_v35, 0.0  ;;  %vm708_vm7 = vcmp.ne.f32.partialorder %v696_v37, 0.0  ;;  %vm710_vm10 = vcmp.lt.f32.partialorder %v686_v35, 0.0  ;;  %vm711_vm12 = vcmp.lt.f32.partialorder %v696_v37, 0.0 }
 0x15b   : > { %vm709_vm13 = vcmp.ne.f32.partialorder %v706_v38, 0.0  ;;  %vm712_vm14 = vcmp.lt.f32.partialorder %v706_v38, 0.0  ;;  %vm713_vm15 = vmand %vm710_vm10, %vm707_vm6  ;;  %v716_v41 = vadd.f32 1.0, %v686_v35  ;;  %v717_v42 = vadd.f32 1.0, %v696_v37 }
 0x15c   : > { %vm714_vm2 = vmand %vm711_vm12, %vm708_vm7  ;;  %v718_v43 = vadd.f32 1.0, %v706_v38  ;;  %v2704_v21 = vmul.f32 %v869_v13, %v2543_v29 }
 0x15d   : > { %vm715_vm3 = vmand %vm712_vm14, %vm709_vm13  ;;  %v719_v44 = vsel %vm713_vm15, %v716_v41, %v686_v35  ;;  %v720_v45 = vsel %vm714_vm2, %v717_v42, %v696_v37  ;;  %v796_v42 = vmax.f32 %v793_v15, 0.0 }
 0x15e   : > { %v721_v46 = vsel %vm715_vm3, %v718_v43, %v706_v38  ;;  %v723_v47 = vadd.f32 %v722_v39, %v719_v44  ;;  %v724_v48 = vadd.f32 %v722_v39, %v720_v45  ;;  %v2695_v43 = vmul.f32 %v869_v13, %v2541_v28 }
 0x15f   : > { %v725_v49 = vadd.f32 %v722_v39, %v721_v46  ;;  %v795_v39 = vmax.f32 %v792_v57, 0.0  ;;  %v2701_v46 = vmul.f32 %v869_v13, %v2533_v23  ;;  %v2713_v28 = vmul.f32 %v869_v13, %v2549_v32 }
 0x160   : > { %v726_v50 = vand.u32 2147483647, %v723_v47  ;;  %v736_v56 = vand.u32 2147483647, %v724_v48  ;;  %v734_v5 = vand.u32 2147483648, %v723_v47  ;;  %v744_v8 = vand.u32 2147483648, %v724_v48 }
 0x161   : > { %v746_v58 = vand.u32 2147483647, %v725_v49  ;;  %v754_v54 = vand.u32 2147483648, %v725_v49  ;;  %v2707_v48 = vmul.f32 %v869_v13, %v2535_v25  ;;  %v2710_v49 = vmul.f32 %v869_v13, %v2537_v26 }
 0x162   : > { %v729_v60 = vfloor.f32 %v726_v50  ;;  %v739_v61 = vfloor.f32 %v736_v56  ;;  %v2717_v29 = vmin.f32 %v796_v42, 1.0 }
 0x163   : > { %v749_v62 = vfloor.f32 %v746_v58 }
 0x164   : > { %v730_v0 = vsub.f32 %v726_v50, %v729_v60  ;;  %v740_v1 = vsub.f32 %v736_v56, %v739_v61  ;;  %v797_v56 = vmax.f32 %v794_v31, 0.0 }
 0x165   : > { %v750_v51 = vsub.f32 %v746_v58, %v749_v62  ;;  %v2715_v58 = vmin.f32 %v795_v39, 1.0 }
 0x166   : > { %vm731_vm4 = vcmp.eq.f32.partialorder %v730_v0, 1.0  ;;  %vm741_vm8 = vcmp.eq.f32.partialorder %v740_v1, 1.0 }
 0x167   : > { %v732_v3 = vsel %vm731_vm4, 0.0, %v730_v0  ;;  %v742_v6 = vsel %vm741_vm8, 0.0, %v740_v1  ;;  %vm751_vm9 = vcmp.eq.f32.partialorder %v750_v51, 1.0 }
 0x168   : > { %v733_v53 = vand.u32 2147483647, %v732_v3  ;;  %v743_v7 = vand.u32 2147483647, %v742_v6  ;;  %v752_v9 = vsel %vm751_vm9, 0.0, %v750_v51 }
 0x169   : > { %v753_v10 = vand.u32 2147483647, %v752_v9 }
 0x16a   : > { %v735_v11 = vor.u32 %v734_v5, %v733_v53  ;;  %v745_v12 = vor.u32 %v744_v8, %v743_v7 }
 0x16b   : > { %v755_v55 = vor.u32 %v754_v54, %v753_v10 }
 0x16c   : > { %vm756_vm11 = vcmp.ne.f32.partialorder %v735_v11, 0.0  ;;  %vm757_vm0 = vcmp.ne.f32.partialorder %v745_v12, 0.0  ;;  %vm759_vm1 = vcmp.lt.f32.partialorder %v735_v11, 0.0  ;;  %vm760_vm5 = vcmp.lt.f32.partialorder %v745_v12, 0.0 }
 0x16d   : > { %vm758_vm6 = vcmp.ne.f32.partialorder %v755_v55, 0.0  ;;  %vm761_vm7 = vcmp.lt.f32.partialorder %v755_v55, 0.0  ;;  %vm762_vm10 = vmand %vm759_vm1, %vm756_vm11  ;;  %v765_v18 = vadd.f32 1.0, %v735_v11  ;;  %v766_v19 = vadd.f32 1.0, %v745_v12 }
 0x16e   : > { %vm763_vm12 = vmand %vm760_vm5, %vm757_vm0  ;;  %v767_v20 = vadd.f32 1.0, %v755_v55 }
 0x16f   : > { %vm764_vm13 = vmand %vm761_vm7, %vm758_vm6  ;;  %v768_v27 = vsel %vm762_vm10, %v765_v18, %v735_v11  ;;  %v769_v30 = vsel %vm763_vm12, %v766_v19, %v745_v12 }
 0x170   : > { %v770_v35 = vsel %vm764_vm13, %v767_v20, %v755_v55  ;;  %v771_v37 = vmul.f32 6.0, %v768_v27  ;;  %v772_v38 = vmul.f32 6.0, %v769_v30  ;;  %v2734_v55 = vmin.f32 %v797_v56, 1.0 }
 0x171   : > { %v773_v41 = vmul.f32 6.0, %v770_v35 }
 0x172   : > { %v774_v44 = vfloor.f32 %v771_v37  ;;  %v775_v45 = vfloor.f32 %v772_v38 }
 0x173   : > { %v776_v47 = vfloor.f32 %v773_v41 }
 0x174   : > { %v777_v17 = vsub.f32 %v771_v37, %v774_v44  ;;  %v778_v50 = vsub.f32 %v772_v38, %v775_v45  ;;  %vm780_vm14 = vcmp.ge.f32.partialorder %v774_v44, 6.0  ;;  %v2014_v60 = vadd.f32 -6.0, %v774_v44 }
 0x175   : > { %v779_v23 = vsub.f32 %v773_v41, %v776_v47  ;;  %v2015_v61 = vadd.f32 -6.0, %v775_v45  ;;  %vm781_vm15 = vcmp.ge.f32.partialorder %v775_v45, 6.0  ;;  %v2016_v0 = vadd.f32 -6.0, %v776_v47 }
 0x176   : > { %v801_v25 = vmul.f32 %v777_v17, %v2629_v59  ;;  %v802_v62 = vmul.f32 %v778_v50, %v2635_v63  ;;  %v816_v26 = vsub.f32 1.0, %v777_v17  ;;  %v817_v1 = vsub.f32 1.0, %v778_v50 }
 0x177   : > { %v803_v32 = vmul.f32 %v779_v23, %v2643_v4  ;;  %vm782_vm2 = vcmp.ge.f32.partialorder %v776_v47, 6.0  ;;  %v818_v52 = vsub.f32 1.0, %v779_v23  ;;  %v2722_v3 = vsel %vm780_vm14, %v2014_v60, %v774_v44 }
 0x178   : > { %v804_v51 = vsub.f32 1.0, %v801_v25  ;;  %v805_v2 = vsub.f32 1.0, %v802_v62  ;;  %v819_v6 = vmul.f32 %v816_v26, %v2629_v59  ;;  %v820_v53 = vmul.f32 %v817_v1, %v2635_v63 }
 0x179   : > { %v806_v5 = vsub.f32 1.0, %v803_v32  ;;  %v2726_v7 = vsel %vm781_vm15, %v2015_v61, %v775_v45  ;;  %v821_v10 = vmul.f32 %v818_v52, %v2643_v4  ;;  %v2731_v54 = vsel %vm782_vm2, %v2016_v0, %v776_v47 }
 0x17a   : > { %v807_v8 = vmul.f32 %v804_v51, %v2552_v33  ;;  %v808_v9 = vmul.f32 %v805_v2, %v2559_v36  ;;  %v822_v12 = vsub.f32 1.0, %v819_v6  ;;  %v823_v13 = vsub.f32 1.0, %v820_v53 }
 0x17b   : > { %v809_v11 = vmul.f32 %v806_v5, %v2566_v40  ;;  %v824_v57 = vsub.f32 1.0, %v821_v10  ;;  %vm838_vm3 = vcmp.lt.f32.partialorder %v2722_v3, 2.0  ;;  %vm839_vm4 = vcmp.lt.f32.partialorder %v2726_v7, 2.0 }
 0x17c   : > { %v810_v14 = vmax.f32 %v807_v8, 0.0  ;;  %v811_v59 = vmax.f32 %v808_v9, 0.0  ;;  %v825_v15 = vmul.f32 %v822_v12, %v2552_v33  ;;  %v826_v18 = vmul.f32 %v823_v13, %v2559_v36 }
 0x17d   : > { %v812_v63 = vmax.f32 %v809_v11, 0.0  ;;  %v827_v20 = vmul.f32 %v824_v57, %v2566_v40  ;;  %vm835_vm8 = vcmp.lt.f32.partialorder %v2722_v3, 1.0  ;;  %vm836_vm9 = vcmp.lt.f32.partialorder %v2726_v7, 1.0 }
 0x17e   : > { %v813_v4 = vmin.f32 %v810_v14, 1.0  ;;  %v814_v19 = vmin.f32 %v811_v59, 1.0  ;;  %vm840_vm11 = vcmp.lt.f32.partialorder %v2731_v54, 2.0  ;;  %v828_v30 = vmax.f32 %v825_v15, 0.0 }
 0x17f   : > { %v815_v27 = vmin.f32 %v812_v63, 1.0  ;;  %v829_v31 = vmax.f32 %v826_v18, 0.0  ;;  %vm837_vm0 = vcmp.lt.f32.partialorder %v2731_v54, 1.0  ;;  %vm841_vm1 = vcmp.lt.f32.partialorder %v2722_v3, 3.0 }
 0x180   : > { %v830_v35 = vmax.f32 %v827_v20, 0.0  ;;  %vm842_vm5 = vcmp.lt.f32.partialorder %v2726_v7, 3.0  ;;  %vm843_vm6 = vcmp.lt.f32.partialorder %v2731_v54, 3.0  ;;  %vm844_vm7 = vcmp.lt.f32.partialorder %v2722_v3, 4.0 }
 0x181   : > { %v831_v37 = vmin.f32 %v828_v30, 1.0  ;;  %v832_v38 = vmin.f32 %v829_v31, 1.0  ;;  %vm845_vm10 = vcmp.lt.f32.partialorder %v2726_v7, 4.0  ;;  %vm846_vm12 = vcmp.lt.f32.partialorder %v2731_v54, 4.0 }
 0x182   : > { %v833_v39 = vmin.f32 %v830_v35, 1.0  ;;  %vm847_vm13 = vcmp.lt.f32.partialorder %v2722_v3, 5.0  ;;  %vm848_vm14 = vcmp.lt.f32.partialorder %v2726_v7, 5.0  ;;  %vm849_vm15 = vcmp.lt.f32.partialorder %v2731_v54, 5.0 }
 0x183   : > { %v850_v41 = vsel %vm847_vm13, %v831_v37, %v2552_v33  ;;  %v851_v42 = vsel %vm848_vm14, %v832_v38, %v2559_v36  ;;  %v876_v44 = vsel %vm844_vm7, %v813_v4, %v2715_v58  ;;  %v877_v45 = vsel %vm845_vm10, %v814_v19, %v2717_v29 }
 0x184   : > { %v852_v47 = vsel %vm849_vm15, %v833_v39, %v2566_v40  ;;  %v853_v17 = vsel %vm844_vm7, %v2715_v58, %v850_v41  ;;  %v854_v50 = vsel %vm845_vm10, %v2717_v29, %v851_v42  ;;  %v878_v56 = vsel %vm846_vm12, %v815_v27, %v2734_v55 }
 0x185   : > { %v855_v23 = vsel %vm846_vm12, %v2734_v55, %v852_v47  ;;  %v856_v60 = vsel %vm841_vm1, %v2715_v58, %v853_v17  ;;  %v857_v61 = vsel %vm842_vm5, %v2717_v29, %v854_v50  ;;  %v879_v25 = vsel %vm841_vm1, %v2552_v33, %v876_v44 }
 0x186   : > { %v858_v62 = vsel %vm843_vm6, %v2734_v55, %v855_v23  ;;  %v859_v26 = vsel %vm838_vm3, %v813_v4, %v856_v60  ;;  %v860_v0 = vsel %vm839_vm4, %v814_v19, %v857_v61  ;;  %v880_v32 = vsel %vm842_vm5, %v2559_v36, %v877_v45 }
 0x187   : > { %v861_v1 = vsel %vm840_vm11, %v815_v27, %v858_v62  ;;  %v862_v51 = vsel %vm835_vm8, %v2552_v33, %v859_v26  ;;  %v863_v2 = vsel %vm836_vm9, %v2559_v36, %v860_v0  ;;  %v881_v52 = vsel %vm843_vm6, %v2566_v40, %v878_v56 }
 0x188   : > { %v864_v5 = vsel %vm837_vm0, %v2566_v40, %v861_v1  ;;  %v866_v6 = vmul.f32 %v2685_v22, %v862_v51  ;;  %v867_v53 = vmul.f32 %v2685_v22, %v863_v2  ;;  %v882_v8 = vsel %vm838_vm3, %v2552_v33, %v879_v25 }
 0x189   : > { %v868_v9 = vmul.f32 %v2685_v22, %v864_v5  ;;  %v883_v10 = vsel %vm839_vm4, %v2559_v36, %v880_v32  ;;  %v884_v11 = vsel %vm840_vm11, %v2566_v40, %v881_v52  ;;  %v885_v12 = vsel %vm835_vm8, %v831_v37, %v882_v8 }
 0x18a   : > { %v873_v13 = vadd.f32 %v2688_v24, %v866_v6  ;;  %v874_v14 = vadd.f32 %v2692_v34, %v867_v53  ;;  %v886_v59 = vsel %vm836_vm9, %v832_v38, %v883_v10  ;;  %v887_v57 = vsel %vm837_vm0, %v833_v39, %v884_v11 }
 0x18b   : > { %v875_v63 = vadd.f32 %v2695_v43, %v868_v9  ;;  %v888_v15 = vmul.f32 %v885_v12, %v2685_v22  ;;  %v889_v18 = vmul.f32 %v886_v59, %v2685_v22  ;;  %v890_v20 = vmul.f32 %v887_v57, %v2685_v22 }
 0x18c   : > { %v897_v24 = vsel %vm847_vm13, %v2552_v33, %v813_v4  ;;  %v898_v34 = vsel %vm848_vm14, %v2559_v36, %v814_v19  ;;  %v899_v30 = vsel %vm849_vm15, %v2566_v40, %v815_v27  ;;  %v921_v31 = vmul.f32 0.2989, %v873_v13 }
 0x18d   : > { %v2851_v43 = vadd.f32 %v2698_v16, %v888_v15  ;;  %v895_v35 = vadd.f32 %v2701_v46, %v889_v18  ;;  %v896_v41 = vadd.f32 %v2704_v21, %v890_v20  ;;  %v900_v4 = vsel %vm844_vm7, %v2552_v33, %v897_v24 }
 0x18e   : > { %v901_v19 = vsel %vm845_vm10, %v2559_v36, %v898_v34  ;;  %v902_v27 = vsel %vm846_vm12, %v2566_v40, %v899_v30  ;;  %v903_v16 = vsel %vm841_vm1, %v831_v37, %v900_v4  ;;  %v922_v42 = vmul.f32 0.2989, %v874_v14 }
 0x18f   : > { %v904_v46 = vsel %vm842_vm5, %v832_v38, %v901_v19  ;;  %v905_v21 = vsel %vm843_vm6, %v833_v39, %v902_v27  ;;  %v906_v33 = vsel %vm838_vm3, %v2715_v58, %v903_v16  ;;  %v923_v44 = vmul.f32 0.2989, %v875_v63 }
 0x190   : > { %v907_v36 = vsel %vm839_vm4, %v2717_v29, %v904_v46  ;;  %v908_v40 = vsel %vm840_vm11, %v2734_v55, %v905_v21  ;;  %v909_v37 = vsel %vm835_vm8, %v2715_v58, %v906_v33  ;;  %v924_v38 = vmul.f32 0.587, %v2851_v43 }
 0x191   : > { %v910_v39 = vsel %vm836_vm9, %v2717_v29, %v907_v36  ;;  %v911_v45 = vsel %vm837_vm0, %v2734_v55, %v908_v40  ;;  %v912_v47 = vmul.f32 %v909_v37, %v2685_v22  ;;  %v925_v17 = vmul.f32 0.587, %v895_v35  ;;  %v993_v37 = vld [vmem:[%s2914_s24] sm:$0xff] }
 0x192   : > { %v913_v50 = vmul.f32 %v910_v39, %v2685_v22  ;;  %v914_v56 = vmul.f32 %v911_v45, %v2685_v22  ;;  %v926_v3 = vmul.f32 0.587, %v896_v41  ;;  %v927_v23 = vadd.f32 %v924_v38, %v921_v31 }
 0x193   : > { %v918_v58 = vadd.f32 %v2707_v48, %v912_v47  ;;  %v928_v60 = vadd.f32 %v925_v17, %v922_v42  ;;  %v953_v25 = vstv %s2848_s18  ;;  %vm3117_vm2 = vcmask 195584   ;;  %s383_s18 = scalar_lea.vmem %s3094_s5, %s2045_s12 }
 0x194   : > { %v919_v61 = vadd.f32 %v2710_v49, %v913_v50  ;;  %v920_v29 = vadd.f32 %v2713_v28, %v914_v56  ;;  %v929_v7 = vadd.f32 %v926_v3, %v923_v44  ;;  %v956_v55 = vmul.f32 %v953_v25, %v875_v63  ;;  %vm3118_vm3 = vmmov %vm3117_vm2 }
 0x195   : > { %v930_v54 = vmul.f32 0.114, %v918_v58  ;;  %v955_v62 = vmul.f32 %v953_v25, %v874_v14  ;;  %v954_v1 = vmul.f32 %v953_v25, %v873_v13  ;;  %vm3119_vm4 = vcmask 191488   ;;  %vm3120_vm0 = vmmov %vm3117_vm2 }
 0x196   : > { %v931_v26 = vmul.f32 0.114, %v919_v61  ;;  %v932_v0 = vmul.f32 0.114, %v920_v29  ;;  %v971_v12 = vmul.f32 %v953_v25, %v896_v41  ;;  %v970_v13 = vmul.f32 %v953_v25, %v895_v35  ;;  %vm3121_vm1 = vmmov %vm3120_vm0 }
 0x197   : > { %v933_v32 = vadd.f32 %v930_v54, %v927_v23  ;;  %v983_v14 = vmul.f32 %v953_v25, %v920_v29  ;;  %v982_v30 = vmul.f32 %v953_v25, %v919_v61  ;;  %v969_v35 = vmul.f32 %v953_v25, %v2851_v43  ;;  %vm3122_vm5 = vmmov %vm3120_vm0 }
 0x198   : > { %v934_v51 = vadd.f32 %v931_v26, %v928_v60  ;;  %v935_v22 = vadd.f32 %v932_v0, %v929_v7  ;;  %v981_v21 = vmul.f32 %v953_v25, %v918_v58  ;;  %vm1029_vm8 = vcmask 162816   ;;  %vm3123_vm6 = vmmov %vm3120_vm0 }
 0x199   : > { %v936_v2 = vsel %vm3117_vm2, %v933_v32, 0.0  ;;  %2094 = vmatprep.mubr.msk.f32.mxu0 %vm1029_vm8, %v993_v37  ;;  %vm1025_vm9 = vcmask 392192   ;;  %vm1036_vm11 = vcmask 1043456   ;;  %v994_v32 = vld [vmem:[%s2914_s24 + $0x8] sm:$0xff]  ;;  %vm3124_vm7 = vmmov %vm3120_vm0  ;;  %s388_s24 = scalar_lea.vmem %s3095_s6, %s2160_s13 }
 0x19a   : > { %v937_v48 = vsel %vm3118_vm3, %v934_v51, 0.0  ;;  %v939_v49 = vsel %vm3119_vm4, %v935_v22, 0.0  ;;  %v1369_v22 = vld [vmem:[%s3091_s2 + $0x10] sm:$0xf]  ;;  %vm3125_vm10 = vmmov %vm3120_vm0 }
 0x19b   : > { %v938_v52 = vadd.f32 %v937_v48, %v936_v2  ;;  %vm3126_vm12 = vmmov %vm3120_vm0 }
 0x19c   : > { %vm3127_vm13 = vmmov %vm3120_vm0 }
 0x19d   : > { %v940_v28 = vadd.f32 %v939_v49, %v938_v52  ;;  %v1362_v49 = vld [vmem:[%s383_s18] sm:$0xff]  ;;  %vm3128_vm14 = vmmov %vm3120_vm0 }
 0x19e   : > { %vm3129_vm15 = vmmov %vm3120_vm0 }
 0x19f   : > { %941 = vadd.xlane.f32.xlu0 %v940_v28  ;;  %vm3130_vm2 = vmmov %vm3120_vm0 }
 0x1a0   : > { %vm3131_vm3 = vmmov %vm3120_vm0 }
 0x1a1   : > { %vm3132_vm4 = vmmov %vm3120_vm0 }
 0x228   : > { %v942_v5 = vpop.xlane.xlu0 %941 }
 0x229   : > { %v943_v6 = vrot.slane %v942_v5, 4 }
 0x22b   : > { %v944_v53 = vadd.f32 %v943_v6, %v942_v5  ;;  %v1368_v5 = vld [vmem:[%s3091_s2 + $0x8] sm:$0xff]  ;;  %v1367_v6 = vld [vmem:[%s3091_s2] sm:$0xff] }
 0x22d   : > { %v945_v8 = vrot.slane %v944_v53, 2 }
 0x22f   : > { %v946_v9 = vadd.f32 %v945_v8, %v944_v53  ;;  %v1363_v53 = vld [vmem:[%s383_s18 + $0x8] sm:$0xff]  ;;  %s2995_s18 = sand.u32 1, %s2351_s28  }
 0x231   : > { %v947_v10 = vrot.slane %v946_v9, 1 }
 0x233   : > { %v948_v11 = vadd.f32 %v947_v10, %v946_v9  ;;  %v1366_v10 = vld [vmem:[%s388_s24 + $0x10] sm:$0xff] }
 0x235   : > { %2163 = vpush %v948_v11  ;;  %v1365_v11 = vld [vmem:[%s388_s24 + $0x8] sm:$0xff] }
 0x266   : > { %s2164_s20 = spop %2163 }
 0x267   : > { %s952_s21 = smul.f32 0.0020833334, %s2164_s20  ;;  %s2921_s20 = scalar_lea.vmem %s3093_s4, %s2160_s13 }
 0x268   : > { %v997_v38 = vld [vmem:[%s2921_s20 + $0x10] sm:$0xff]  ;;  %v995_v51 = vld [vmem:[%s2921_s20] sm:$0xff]  ;;  %s2368_s13 = smov 32  }
 0x269   : > { %s958_s22 = smul.f32 %s957_s19, %s952_s21  ;;  %2097 = vmatprep.subr.mxu1 %v997_v38 }
 0x26a   : > { %2098 = vmatpush3.msra.mxu1 %v997_v38 }
 0x26b   : > { %v959_v59 = vstv %s958_s22 }
 0x26c   : > { %v974_v57 = vadd.f32 %v971_v12, %v959_v59  ;;  %v973_v63 = vadd.f32 %v970_v13, %v959_v59  ;;  %v986_v15 = vadd.f32 %v983_v14, %v959_v59  ;;  %v962_v18 = vadd.f32 %v959_v59, %v956_v55  ;;  %v1364_v12 = vld [vmem:[%s388_s24] sm:$0xff]  ;;  %s2370_s24 = smov [#allocation5]  }
 0x26d   : > { %v961_v20 = vadd.f32 %v959_v59, %v955_v62  ;;  %v985_v27 = vadd.f32 %v982_v30, %v959_v59  ;;  %v960_v41 = vadd.f32 %v959_v59, %v954_v1  ;;  %v972_v46 = vadd.f32 %v969_v35, %v959_v59  ;;  %v996_v1 = vld [vmem:[%s2921_s20 + $0x8] sm:$0xff]  ;;  %s2047_s20 = sshll.u32 %s2442_s9, 8  ;;  %s1820_s9 = scalar_lea.sflag [#allocation3], %s2995_s18 }
 0x26e   : > { %v977_v24 = vmax.f32 %v974_v57, 0.0  ;;  %v976_v34 = vmax.f32 %v973_v63, 0.0  ;;  %v989_v19 = vmax.f32 %v986_v15, 0.0  ;;  %v984_v36 = vadd.f32 %v981_v21, %v959_v59  ;;  %2099 = vmatprep.subr.mxu1 %v996_v1  ;;  %s3015_s12 = scalar_lea.hbm %s3096_s7, %s2047_s20 }
 0x26f   : > { %v988_v42 = vmax.f32 %v985_v27, 0.0  ;;  %v975_v44 = vmax.f32 %v972_v46, 0.0  ;;  %v965_v45 = vmax.f32 %v962_v18, 0.0  ;;  %v964_v50 = vmax.f32 %v961_v20, 0.0  ;;  %2100 = vmatpush3.msra.mxu1 %v996_v1 }
 0x270   : > { %v980_v31 = vmin.f32 %v977_v24, 1.0  ;;  %v979_v4 = vmin.f32 %v976_v34, 1.0  ;;  %v992_v16 = vmin.f32 %v989_v19, 1.0  ;;  %v987_v40 = vmax.f32 %v984_v36, 0.0  ;;  %2101 = vmatprep.subr.mxu1 %v995_v51 }
 0x271   : > { %v991_v33 = vmin.f32 %v988_v42, 1.0  ;;  %v978_v43 = vmin.f32 %v975_v44, 1.0  ;;  %v968_v17 = vmin.f32 %v965_v45, 1.0  ;;  %v967_v60 = vmin.f32 %v964_v50, 1.0  ;;  %2102 = vmatpush3.msra.mxu1 %v995_v51 }
 0x272   : > { %1005 = vrot.lane.b32.xlu1 %v980_v31, %s2363_s25  ;;  %1003 = vrot.lane.b32.xlu0 %v979_v4, %s2363_s25  ;;  %v990_v39 = vmin.f32 %v987_v40, 1.0  ;;  %v963_v25 = vmax.f32 %v960_v41, 0.0 }
 0x273   : > { %2115 = vmatprep.subr.mxu1 %v997_v38 }
 0x274   : > { %v966_v55 = vmin.f32 %v963_v25, 1.0 }
 0x276   : > { %1017 = vrot.lane.b32.xlu1 %v992_v16, %s2364_s26 }
 0x27a   : > { %1015 = vrot.lane.b32.xlu1 %v991_v33, %s2364_s26 }
 0x27e   : > { %1001 = vrot.lane.b32.xlu1 %v978_v43, %s2363_s25  ;;  %s2365_s25 = smov 80  }
 0x282   : > { %1013 = vrot.lane.b32.xlu1 %v990_v39, %s2364_s26 }
 0x2e4   : > { %v1006_v47 = vpop.permute.xlu1 %1005  ;;  %v1004_v23 = vpop.permute.xlu0 %1003 }
 0x2e5   : > { %v1024_v56 = vsel %vm3120_vm0, %v968_v17, %v1006_v47  ;;  %v1023_v61 = vsel %vm3121_vm1, %v967_v60, %v1004_v23  ;;  %vm1744_vm1 = vcmask 261120  }
 0x2e8   : > { %v1018_v3 = vpop.permute.xlu1 %1017 }
 0x2e9   : > { %v1028_v58 = vsel %vm1025_vm9, %v1024_v56, %v1018_v3 }
 0x2ea   : > { %2088 = vmatprep.subr.msk.mxu0 %vm1036_vm11, %v1028_v58 }
 0x2eb   : > { %2089 = vmatpush3.msk.msra.mxu0 %vm1036_vm11, %v1028_v58 }
 0x2ec   : > { %v1016_v29 = vpop.permute.xlu1 %1015 }
 0x2ed   : > { %v1027_v7 = vsel %vm1025_vm9, %v1023_v61, %v1016_v29 }
 0x2ee   : > { %2090 = vmatprep.subr.mxu0 %v1027_v7 }
 0x2ef   : > { %2091 = vmatpush3.msra.mxu0 %v1027_v7 }
 0x2f0   : > { %v1002_v54 = vpop.permute.xlu1 %1001 }
 0x2f1   : > { %v1022_v62 = vsel %vm3122_vm5, %v966_v55, %v1002_v54  ;;  %vm1749_vm5 = vcmask 523264  }
 0x2f4   : > { %v1014_v26 = vpop.permute.xlu1 %1013 }
 0x2f5   : > { %v1026_v0 = vsel %vm1025_vm9, %v1022_v62, %v1014_v26 }
 0x2f6   : > { %2092 = vmatprep.subr.mxu0 %v1026_v0 }
 0x2f7   : > { %2093 = vmatpush3.msra.mxu0 %v1026_v0 }
 0x2f8   : > { %2095 = vmatmul.mubr.msk.f32.vlgmr.msra.gmra.mxu0 %vm1029_vm8, %v994_v32  ;;  %2106 = vmatprep.subr.mxu0 %v997_v38 }
 0x2f9   : > { %2107 = vmatpush3.msra.mxu0 %v997_v38 }
 0x2fa   : > { %2108 = vmatprep.subr.mxu0 %v996_v1 }
 0x2fb   : > { %2109 = vmatpush3.msra.mxu0 %v996_v1 }
 0x2fc   : > { %2110 = vmatprep.subr.mxu0 %v995_v51 }
 0x2fd   : > { %2111 = vmatpush3.msra.mxu0 %v995_v51 }
 0x2fe   : > { %2124 = vmatprep.subr.msk.mxu0 %vm1036_vm11, %v1369_v22 }
 0x3b8   : > { %v2096_v2 = vpop.f32.mrf.mxu0 }
 0x3b9   : > { %1281 = vrot.lane.b32.xlu0 %v2096_v2, %s2365_s25 }
 0x3ba   : > { %v1106_v48 = vpop.f32.mrf.mxu0 }
 0x3bb   : > { %1196 = vrot.lane.b32.xlu1 %v1106_v48, %s2366_s17  ;;  %2103 = vmatprep.mubr.msk.f32.mxu1 %vm3123_vm6, %v1106_v48  ;;  %vm1752_vm6 = vcmask 654336  }
 0x3bc   : > { %2104 = vmatmul.mubr.msk.f32.vlgmr.msra.gmra.mxu1 %vm3124_vm7, %v2096_v2  ;;  %vm1755_vm7 = vcmask 785408  }
 0x3bd   : > { %2116 = vmatpush3.msra.mxu1 %v997_v38 }
 0x3be   : > { %2117 = vmatprep.subr.mxu1 %v996_v1 }
 0x3bf   : > { %1198 = vrot.lane.b32.xlu1 %v2096_v2, %s2366_s17  ;;  %2118 = vmatpush3.msra.mxu1 %v996_v1 }
 0x3c0   : > { %2119 = vmatprep.subr.mxu1 %v995_v51 }
 0x3c1   : > { %2120 = vmatpush3.msra.mxu1 %v995_v51 }
 0x3c2   : > { %2133 = vmatprep.subr.mxu1 %v1366_v10 }
 0x3c3   : > { %1279 = vrot.lane.b32.xlu1 %v1106_v48, %s2365_s25 }
 0x42b   : > { %v1282_v9 = vpop.permute.xlu0 %1281 }
 0x42d   : > { %v1197_v52 = vpop.permute.xlu1 %1196 }
 0x42e   : > { %2112 = vmatprep.mubr.msk.f32.mxu0 %vm3125_vm10, %v1197_v52 }
 0x431   : > { %v1199_v28 = vpop.permute.xlu1 %1198 }
 0x432   : > { %2113 = vmatmul.mubr.msk.f32.vlgmr.msra.gmra.mxu0 %vm3126_vm12, %v1199_v28 }
 0x433   : > { %2125 = vmatpush3.msk.msra.mxu0 %vm1036_vm11, %v1369_v22  ;;  %2130 = vmatprep.mubr.msk.f32.mxu0 %vm1029_vm8, %v1362_v49  ;;  %vm3134_vm11 = vmmov %vm3120_vm0 }
 0x434   : > { %2126 = vmatprep.subr.mxu0 %v1368_v5 }
 0x435   : > { %2127 = vmatpush3.msra.mxu0 %v1368_v5  ;;  %v1280_v8 = vpop.permute.xlu1 %1279 }
 0x436   : > { %2128 = vmatprep.subr.mxu0 %v1367_v6  ;;  %2121 = vmatprep.mubr.msk.f32.mxu1 %vm3127_vm13, %v1280_v8 }
 0x437   : > { %2129 = vmatpush3.msra.mxu0 %v1367_v6  ;;  %2122 = vmatmul.mubr.msk.f32.vlgmr.msra.gmra.mxu1 %vm3128_vm14, %v1282_v9 }
 0x438   : > { %2131 = vmatmul.mubr.msk.f32.vlgmr.msra.gmra.mxu0 %vm1029_vm8, %v1363_v53  ;;  %2142 = vmatprep.subr.mxu0 %v1366_v10  ;;  %vm3133_vm8 = vmmov %vm3120_vm0  ;;  %vm1741_vm0 = vcmask 130048  }
 0x439   : > { %2134 = vmatpush3.msra.mxu1 %v1366_v10  ;;  %2143 = vmatpush3.msra.mxu0 %v1366_v10 }
 0x43a   : > { %2135 = vmatprep.subr.mxu1 %v1365_v11  ;;  %2144 = vmatprep.subr.mxu0 %v1365_v11 }
 0x43b   : > { %2136 = vmatpush3.msra.mxu1 %v1365_v11  ;;  %2145 = vmatpush3.msra.mxu0 %v1365_v11 }
 0x43c   : > { %2137 = vmatprep.subr.mxu1 %v1364_v12  ;;  %2146 = vmatprep.subr.mxu0 %v1364_v12 }
 0x43d   : > { %2138 = vmatpush3.msra.mxu1 %v1364_v12  ;;  %2147 = vmatpush3.msra.mxu0 %v1364_v12 }
 0x43e   : > { %2151 = vmatprep.subr.mxu1 %v1366_v10 }
 0x47c   : > { %v2105_v24 = vpop.f32.mrf.mxu1 }
 0x47e   : > { %v2982_v34 = vpop.f32.mrf.mxu1 }
 0x4f2   : > { %v2114_v13 = vpop.f32.mrf.mxu0 }
 0x4f4   : > { %v1270_v14 = vpop.f32.mrf.mxu0 }
 0x4f7   : > { %v2123_v30 = vpop.f32.mrf.mxu1 }
 0x4f8   : > { %v2132_v59 = vpop.f32.mrf.mxu0 }
 0x4f9   : > { %1537 = vrot.lane.b32.xlu0 %v2132_v59, %s2366_s17  ;;  %v1353_v31 = vpop.f32.mrf.mxu1 }
 0x4fa   : > { %v1445_v57 = vpop.f32.mrf.mxu0 }
 0x4fb   : > { %1535 = vrot.lane.b32.xlu1 %v1445_v57, %s2366_s17  ;;  %2139 = vmatprep.mubr.msk.f32.mxu1 %vm3129_vm15, %v1445_v57  ;;  %s2369_s17 = smov 64  }
 0x4fc   : > { %2140 = vmatmul.mubr.msk.f32.vlgmr.msra.gmra.mxu1 %vm3130_vm2, %v2132_v59 }
 0x4fd   : > { %1620 = vrot.lane.b32.xlu0 %v2132_v59, %s2365_s25  ;;  %2152 = vmatpush3.msra.mxu1 %v1366_v10 }
 0x4fe   : > { %2153 = vmatprep.subr.mxu1 %v1365_v11 }
 0x4ff   : > { %1618 = vrot.lane.b32.xlu1 %v1445_v57, %s2365_s25  ;;  %2154 = vmatpush3.msra.mxu1 %v1365_v11 }
 0x500   : > { %2155 = vmatprep.subr.mxu1 %v1364_v12 }
 0x501   : > { %2156 = vmatpush3.msra.mxu1 %v1364_v12 }
 0x56b   : > { %v1538_v63 = vpop.permute.xlu0 %1537 }
 0x56d   : > { %v1536_v15 = vpop.permute.xlu1 %1535 }
 0x56e   : > { %2148 = vmatprep.mubr.msk.f32.mxu0 %vm3131_vm3, %v1536_v15 }
 0x56f   : > { %2149 = vmatmul.mubr.msk.f32.vlgmr.msra.gmra.mxu0 %vm3132_vm4, %v1538_v63  ;;  %v1621_v20 = vpop.permute.xlu0 %1620 }
 0x571   : > { %v1619_v18 = vpop.permute.xlu1 %1618 }
 0x572   : > { %2157 = vmatprep.mubr.msk.f32.mxu1 %vm3133_vm8, %v1619_v18 }
 0x573   : > { %2158 = vmatmul.mubr.msk.f32.vlgmr.msra.gmra.mxu1 %vm3134_vm11, %v1621_v20 }
 0x5bc   : > { %v2141_v4 = vpop.f32.mrf.mxu1 }
 0x5bd   : > { %v1766_v27 = vsel %vm1741_vm0, %v2141_v4, -inf }
 0x5be   : > { %v1526_v19 = vpop.f32.mrf.mxu1 }
 0x5bf   : > { %v1765_v35 = vsel %vm1741_vm0, %v1526_v19, -inf }
 0x5c0   : > { %v1767_v41 = vmax.f32 %v1765_v35, %v1766_v27 }
 0x5c2   : > { %1768 = vmax.xlane.f32.xlu1 %v1767_v41 }
 0x5d3   : > { %1703 = vrot.lane.b32.xlu1 %v1270_v14, %s2367_s10 }
 0x5d7   : > { %1711 = vrot.lane.b32.xlu1 %v1353_v31, %s2368_s13 }
 0x5db   : > { %1713 = vrot.lane.b32.xlu1 %v2123_v30, %s2368_s13 }
 0x5df   : > { %1721 = vrot.lane.b32.xlu1 %v2141_v4, %s2364_s26 }
 0x62f   : > { %v2150_v16 = vpop.f32.mrf.mxu0 }
 0x630   : > { %1729 = vrot.lane.b32.xlu1 %v2150_v16, %s2369_s17  ;;  %v1784_v46 = vsel %vm1741_vm0, %v2150_v16, -inf }
 0x631   : > { %v1609_v42 = vpop.f32.mrf.mxu0 }
 0x632   : > { %v1783_v21 = vsel %vm1741_vm0, %v1609_v42, -inf }
 0x633   : > { %v2159_v33 = vpop.f32.mrf.mxu1  ;;  %v1785_v44 = vmax.f32 %v1783_v21, %v1784_v46 }
 0x634   : > { %1737 = vrot.lane.b32.xlu1 %v2159_v33, %s2365_s25  ;;  %v1802_v43 = vsel %vm1741_vm0, %v2159_v33, -inf }
 0x635   : > { %1786 = vmax.xlane.f32.xlu0 %v1785_v44  ;;  %v1692_v36 = vpop.f32.mrf.mxu1 }
 0x636   : > { %v1801_v40 = vsel %vm1741_vm0, %v1692_v36, -inf }
 0x637   : > { %v1803_v37 = vmax.f32 %v1801_v40, %v1802_v43 }
 0x639   : > { %1804 = vmax.xlane.f32.xlu0 %v1803_v37 }
 0x64b   : > { %v1769_v38 = vpop.xlane.xlu1 %1768 }
 0x64c   : > { %v1770_v39 = vrot.slane %v1769_v38, 4 }
 0x64e   : > { %v1771_v45 = vmax.f32 %v1769_v38, %v1770_v39 }
 0x64f   : > { %1705 = vrot.lane.b32.xlu0 %v2114_v13, %s2367_s10  ;;  %v1704_v3 = vpop.permute.xlu1 %1703  ;;  %s2269_s10 = sshll.u32 %s2370_s24, 4  ;;  %s2270_s10 = int_to_ptr.vmem [resolvable:$false] %s2269_s10 }
 0x650   : > { %v1772_v47 = vrot.slane %v1771_v45, 2  ;;  %v1742_v12 = vsel %vm1741_vm0, %v2982_v34, %v1704_v3  ;;  %s2271_s13 = scalar_lea.vmem %s2270_s10, 512 }
 0x652   : > { %v1773_v17 = vmax.f32 %v1771_v45, %v1772_v47 }
 0x653   : > { %1719 = vrot.lane.b32.xlu0 %v1526_v19, %s2364_s26  ;;  %v1712_v23 = vpop.permute.xlu1 %1711  ;;  %s1999_s26 = sshll.u32 %s2995_s18, 4 }
 0x654   : > { %v1774_v50 = vrot.slane %v1773_v17, 1  ;;  %v1745_v13 = vsel %vm1744_vm1, %v1742_v12, %v1712_v23 }
 0x656   : > { %v1775_v56 = vmax.f32 %v1773_v17, %v1774_v50 }
 0x657   : > { %1727 = vrot.lane.b32.xlu0 %v1609_v42, %s2369_s17  ;;  %v1714_v58 = vpop.permute.xlu1 %1713 }
 0x658   : > { %2165 = vpush %v1775_v56 }
 0x65b   : > { %1735 = vrot.lane.b32.xlu0 %v1692_v36, %s2365_s25  ;;  %v1722_v29 = vpop.permute.xlu1 %1721  ;;  %s361_s25 = scalar_lea.vmem [#allocation5], %s1999_s26 }
 0x65c   : > { %s1838_s19 = sshll.u32 %s361_s25, 4  ;;  %s3009_s19 = int_to_ptr.vmem [resolvable:$true] %s1838_s19 }
 0x65d   : > { %s2265_s0 = scalar_lea.vmem %s3009_s19, 256  ;;  %p2272_p13 = scmp.lt.s32.totalorder %s3009_s19, %s2270_s10 }
 0x65e   : > { %p2266_p10 = scmp.ne.s32.totalorder %s3009_s19, %s2265_s0  ;;  %p2273_p0 = scmp.lt.s32.totalorder %s2271_s13, %s2265_s0 }
 0x660   : > { %p2267_p11 = pnand %p2266_p10, %p2459_p5  ;;  %p2274_p1 = por %p2273_p0, %p2272_p13 }
 0x662   : > { %p2268_p12 = pneg %p2267_p11 }
 0x664   : > { %p2275_p2 = pnand %p2274_p1, %p2268_p12 }
 0x6a2   : > { %v1730_v62 = vpop.permute.xlu1 %1729 }
 0x6a6   : > { %v1738_v28 = vpop.permute.xlu1 %1737 }
 0x6be   : > { %v1787_v60 = vpop.xlane.xlu0 %1786 }
 0x6bf   : > { %v1788_v61 = vrot.slane %v1787_v60, 4 }
 0x6c1   : > { %v1789_v7 = vmax.f32 %v1787_v60, %v1788_v61 }
 0x6c2   : > { %v1805_v25 = vpop.xlane.xlu0 %1804 }
 0x6c3   : > { %v1790_v54 = vrot.slane %v1789_v7, 2  ;;  %v1806_v55 = vrot.slane %v1805_v25, 4 }
 0x6c5   : > { %v1807_v26 = vmax.f32 %v1805_v25, %v1806_v55  ;;  %v1791_v0 = vmax.f32 %v1789_v7, %v1790_v54 }
 0x6c6   : > { %v1706_v32 = vpop.permute.xlu0 %1705 }
 0x6c7   : > { %v1808_v1 = vrot.slane %v1807_v26, 2  ;;  %v1743_v51 = vsel %vm1741_vm0, %v2105_v24, %v1706_v32  ;;  %v1792_v22 = vrot.slane %v1791_v0, 1 }
 0x6c8   : > { %v1746_v2 = vsel %vm1744_vm1, %v1743_v51, %v1714_v58 }
 0x6c9   : > { %v1748_v48 = vsel %vm1025_vm9, %v1746_v2, %v1722_v29  ;;  %v1793_v52 = vmax.f32 %v1791_v0, %v1792_v22  ;;  %v1809_v49 = vmax.f32 %v1807_v26, %v1808_v1 }
 0x6ca   : > { %v1720_v5 = vpop.permute.xlu0 %1719  ;;  %v1751_v6 = vsel %vm1749_vm5, %v1748_v48, %v1730_v62 }
 0x6cb   : > { %2167 = vpush %v1793_v52  ;;  %v1810_v53 = vrot.slane %v1809_v49, 1  ;;  %v1754_v8 = vsel %vm1752_vm6, %v1751_v6, %v1738_v28  ;;  %v1747_v14 = vsel %vm1025_vm9, %v1745_v13, %v1720_v5 }
 0x6cc   : > { %v1757_v9 = vsel %vm1755_vm7, %v1754_v8, 0.0 }
 0x6cd   : > { %v1811_v10 = vmax.f32 %v1809_v49, %v1810_v53  ;;  %1759 = vst [vmem:[%s361_s25 + $0x8] sm:$0xff] %v1757_v9 }
 0x6ce   : > { %v1728_v11 = vpop.permute.xlu0 %1727 }
 0x6cf   : > { %2169 = vpush %v1811_v10  ;;  %v1750_v59 = vsel %vm1749_vm5, %v1747_v14, %v1728_v11 }
 0x6d2   : > { %v1736_v57 = vpop.permute.xlu0 %1735 }
 0x6d3   : > { %v1753_v63 = vsel %vm1752_vm6, %v1750_v59, %v1736_v57 }
 0x6d4   : > { %v1756_v15 = vsel %vm1755_vm7, %v1753_v63, 0.0 }
 0x6d5   : > { %1758 = vst [vmem:[%s361_s25] sm:$0xff] %v1756_v15 }
 0x6d6   : > { %2278 = shalt.err (!%p2275_p2)
}
 0x6d7   : > { %s2279_s17 = scalar_lea.hbm %s3015_s12, 256  ;;  %s2283_s20 = scalar_lea.hbm %s3096_s7, 2048 }
 0x6d8   : > { %p2280_p3 = scmp.ne.s32.totalorder %s3015_s12, %s2279_s17  ;;  %p2284_p8 = scmp.lt.s32.totalorder %s3015_s12, %s3096_s7 }
 0x6d9   : > { %p2285_p9 = scmp.lt.s32.totalorder %s2283_s20, %s2279_s17 }
 0x6da   : > { %p2281_p4 = pnand %p2280_p3, %p2459_p5 }
 0x6db   : > { %p2286_p10 = por %p2285_p9, %p2284_p8 }
 0x6dc   : > { %p2282_p7 = pneg %p2281_p4 }
 0x6de   : > { %p2287_p11 = pnand %p2286_p10, %p2282_p7 }
 0x6e0   : > { %2290 = shalt.err (!%p2287_p11)
}
 0x6e1   : > { %s2371_s0 = smov 128   ;;  %s2372_s24 = smov 8   ;;  %v1760_v18 = vlaneseq  ;;  %v2373_v24 = vmov 0.0   ;;  %v2374_v21 = vmov 0  }
 0x6e2   : > { %2175 = dma.vmem_to_hbm [thread:$0]  (%p2459_p5), %s3009_s19, 256, %s3015_s12, %s1820_s9, %s2371_s0, %s2371_s0, %s2372_s24  }
 0x6e3   : > { %v1761_v20 = vand.u32 127, %v1760_v18  ;;  %s2166_s10 = spop %2165  ;;  %s2000_s17 = sshll.u32 %s2995_s18, 3 }
 0x6e4   : > { %v1777_v31 = vstv %s2166_s10  ;;  %s368_s19 = scalar_lea.vmem [#allocation6], %s2000_s17  ;;  %s3047_s20 = scalar_lea.hbm %s3097_s8, %s2488_s23 }
 0x6e5   : > { %vm1780_vm9 = vcmp.eq.s32.totalorder %v1761_v20, 1  ;;  %vm1762_vm10 = vcmp.eq.s32.totalorder %v1761_v20, 0  ;;  %vm1798_vm12 = vcmp.eq.s32.totalorder %v1761_v20, 2  ;;  %s1854_s12 = sshll.u32 %s368_s19, 4  ;;  %s1825_s21 = scalar_lea.sflag [#allocation7], %s2995_s18  ;;  %s3049_s12 = int_to_ptr.vmem [resolvable:$true] %s1854_s12 }
 0x6e6   : > { %v2036_v34 = vsel %vm1780_vm9, 1.0, %v2373_v24  ;;  %v2035_v30 = vsel %vm1762_vm10, 1.0, %v2373_v24  ;;  %v2037_v27 = vsel %vm1798_vm12, 1.0, %v2373_v24  ;;  %s2291_s22 = scalar_lea.vmem %s3049_s12, 128  ;;  %s2375_s0 = smov [#allocation6]  }
 0x6e7   : > { %v1778_v35 = vmul.f32 %v2035_v30, %v1777_v31  ;;  %p2292_p12 = scmp.ne.s32.totalorder %s3049_s12, %s2291_s22  ;;  %s2295_s24 = sshll.u32 %s2375_s0, 4  ;;  %s2296_s24 = int_to_ptr.vmem [resolvable:$false] %s2295_s24 }
 0x6e8   : > { %s2297_s10 = scalar_lea.vmem %s2296_s24, 256  ;;  %p2298_p1 = scmp.lt.s32.totalorder %s3049_s12, %s2296_s24 }
 0x6e9   : > { %p2293_p13 = pnand %p2292_p12, %p2459_p5  ;;  %p2299_p2 = scmp.lt.s32.totalorder %s2297_s10, %s2291_s22 }
 0x6eb   : > { %p2294_p0 = pneg %p2293_p13  ;;  %p2300_p3 = por %p2299_p2, %p2298_p1 }
 0x6ed   : > { %p2301_p4 = pnand %p2300_p3, %p2294_p0 }
 0x6fc   : > { %s2168_s13 = spop %2167 }
 0x6fd   : > { %v1795_v4 = vstv %s2168_s13 }
 0x6fe   : > { %v1796_v19 = vmul.f32 %v2036_v34, %v1795_v4 }
 0x700   : > { %s2170_s26 = spop %2169  ;;  %v1797_v16 = vadd.f32 %v1796_v19, %v1778_v35 }
 0x701   : > { %v1813_v41 = vstv %s2170_s26 }
 0x702   : > { %v1814_v42 = vmul.f32 %v2037_v27, %v1813_v41 }
 0x704   : > { %v1815_v46 = vadd.f32 %v1814_v42, %v1797_v16 }
 0x706   : > { %vm1816_vm13 = vcmp.gt.f32.partialorder %v1815_v46, 0.5 }
 0x707   : > { %v1817_v33 = vsel %vm1816_vm13, 1, %v2374_v21 }
 0x708   : > { %1818 = vst [vmem:[%s368_s19] sm:$0xff] %v1817_v33 }
 0x709   : > { %2304 = shalt.err (!%p2301_p4)
}
 0x70a   : > { %s2305_s23 = scalar_lea.hbm %s3047_s20, 128  ;;  %s2309_s17 = scalar_lea.hbm %s3097_s8, 1024 }
 0x70b   : > { %p2306_p7 = scmp.ne.s32.totalorder %s3047_s20, %s2305_s23  ;;  %p2310_p10 = scmp.lt.s32.totalorder %s3047_s20, %s3097_s8 }
 0x70c   : > { %p2311_p11 = scmp.lt.s32.totalorder %s2309_s17, %s2305_s23 }
 0x70d   : > { %p2307_p8 = pnand %p2306_p7, %p2459_p5 }
 0x70e   : > { %p2312_p12 = por %p2311_p11, %p2310_p10 }
 0x70f   : > { %p2308_p9 = pneg %p2307_p8 }
 0x711   : > { %p2313_p13 = pnand %p2312_p12, %p2308_p9 }
 0x713   : > { %2316 = shalt.err (!%p2313_p13)
}
 0x714   : > { %2176 = dma.vmem_to_hbm [thread:$0]  (%p2459_p5), %s3049_s12, 128, %s3047_s20, %s1825_s21  }
 0x715 PF: > { %p2192_p0 = scmp.ge.s32.totalorder %s2359_s30, 2  ;;  %s1866_s9 = sand.u32 1, %s2347_s27  }
 0x716   : > { %s1867_s25 = scalar_lea.sflag [#allocation3], %s1866_s9 }
 0x717   : > { %p2184_p1 = pnand %p2192_p0, %p2463_p6 }
 0x719   : > { %p2185_p2 = pneg %p2184_p1 }
 0x71b   : > { %2338 = dma.done.wait (%p2185_p2), %s1867_s25, 256  }
 0x71c   : > { %2340 = vsyncadd (%p2185_p2), %s1867_s25, 4294967040  ;;  %s1876_s22 = scalar_lea.sflag [#allocation7], %s1866_s9 }
 0x71d   : > { %2342 = dma.done.wait (%p2185_p2), %s1876_s22, 128  }
 0x71e   : > { %2344 = vsyncadd (%p2185_p2), %s1876_s22, 4294967168  ;;  %p23_p5 = scmp.ge.s32.totalorder %s2446_s11, 10   ;;  %s3135_s27 = smov %s2351_s28 }
 0x71f   : > { %s3136_s28 = smov %s2355_s29  ;;  %s3137_s29 = smov %s2457_s14 }
 0x720   : > { %s3138_s30 = smov %s2446_s11  ;;  %25 = sbr.rel (!%p23_p5) target bundleno = 8 (0x8), region = 116 }
 0x725   :  { %1881 = vsyncpa [#allocation3], 1 }
 0x726   :  { %1883 = vsyncpa [#allocation3 + $0x1], 1 }
 0x727   :  { %1884 = vsyncpa [#allocation7], 1 }
 0x728   :  { %1886 = vsyncpa [#allocation7 + $0x1], 1 }
 0x729   :  { %1887 = vsyncpa [#allocation4], 1 }
 0x72a   :  { %1889 = vsyncpa [#allocation4 + $0x1], 1 }

</bundles_post_ra>
